<compile_context>
chip_gen: v5e
topology: v5e:2x2
jax: 0.10.0
libtpu: 0.0.40
codegen_flags: <defaults>
</compile_context>

<pallas_src>
import jax
import jax.numpy as jnp
from jax.experimental import pallas as pl
from jax.experimental.pallas import tpu as pltpu


# ---------------------------------------------------------------------------
# Kernel
# ---------------------------------------------------------------------------
def _make_rnd_kernel(n_linear, compute_dtype):
    """Kernel for the fused MLP: last layer already emits f(x) - f_hat(x)."""

    def kernel(*refs):
        x_ref = refs[0]
        param_refs = refs[1:-1]          # W0, b0, W1, b1, ... (fused params)
        out_ref = refs[-1]               # (1, batch_tile) lane-dense

        h = x_ref[...].astype(compute_dtype)
        for li in range(n_linear):
            w = param_refs[2 * li][...].astype(compute_dtype)
            b = param_refs[2 * li + 1][...]                     # (1, out) f32
            h = jnp.dot(h, w, preferred_element_type=jnp.float32) + b
            if li < n_linear - 1:
                h = jnp.tanh(h.astype(compute_dtype))
        # h == f(x) - f_hat(x), shape (batch_tile, output_size), f32 accumulation.
        err = jnp.mean(h * h, axis=1)                           # (batch_tile,)
        out_ref[...] = err[None, :]                             # (1, batch_tile)

    return kernel


# ---------------------------------------------------------------------------
# Parameter fusion (done once in the wrapper, outside pallas_call)
# ---------------------------------------------------------------------------
def fuse_rnd_params(f_params, f_hat_params):
    """Fuse f and f_hat into a single MLP whose final output is f(x) - f_hat(x).

    Layer 0:        W = [Wf | Wg]                 (ob_dim, 2*size)
    Hidden layers:  W = blockdiag(Wf, Wg)         (2*size, 2*size)
    Final layer:    W = [Wf ; -Wg], b = bf - bg   (2*size, output_size)
    """
    assert len(f_params) == len(f_hat_params)
    n_linear = len(f_params) // 2
    fused = []
    for li in range(n_linear):
        wf, bf = f_params[2 * li], f_params[2 * li + 1]
        wg, bg = f_hat_params[2 * li], f_hat_params[2 * li + 1]
        last = li == n_linear - 1
        if last:
            if li == 0:                                   # n_layers == 0 degenerate case
                w = wf - wg
            else:
                w = jnp.concatenate([wf, -wg], axis=0)
            b = bf - bg
        elif li == 0:
            w = jnp.concatenate([wf, wg], axis=1)
            b = jnp.concatenate([bf, bg], axis=1)
        else:
            w = jnp.concatenate(
                [jnp.concatenate([wf, jnp.zeros_like(wg)], axis=1),
                 jnp.concatenate([jnp.zeros_like(wf), wg], axis=1)], axis=0)
            b = jnp.concatenate([bf, bg], axis=1)
        fused += [w, b]
    return fused


# ---------------------------------------------------------------------------
# VMEM budget helper
# ---------------------------------------------------------------------------
def _padded_vmem_bytes(shape, itemsize=4):
    r = shape[-2] if len(shape) >= 2 else 1
    c = shape[-1]
    lead = 1
    for d in shape[:-2]:
        lead *= d
    return lead * (-(-r // 8) * 8) * (-(-c // 128) * 128) * itemsize


def _vmem_limit_bytes(ob_dim, batch_tile, params):
    budget = 2 * _padded_vmem_bytes((batch_tile, ob_dim))            # 2x-buffered x tile
    budget += 2 * _padded_vmem_bytes((1, batch_tile))                # 2x-buffered out tile
    budget += 2 * sum(_padded_vmem_bytes(p.shape) for p in params)   # param buffers
    # 2x headroom, at least 32 MiB (also lifts v5e's 16 MiB scoped default),
    # capped at v7x's 64 MiB physical VMEM.
    return int(min(max(2 * budget, 32 * 1024 * 1024), 64 * 1024 * 1024))


# ---------------------------------------------------------------------------
# Wrapper
# ---------------------------------------------------------------------------
def rnd_forward(ob_no, f_params, f_hat_params, *, batch_tile=256,
                compute_dtype=jnp.float32):
    """RND exploration error per row of ob_no via a Pallas TPU kernel.

    ob_no:        (N, ob_dim) float32
    f_params:     flat list [W0, b0, W1, b1, ...], W: (in, out), b: (1, out)
    f_hat_params: same structure
    returns:      (N,) float32

    compute_dtype: jnp.bfloat16 is recommended on v6e/v7x; keep float32 on v5e.
    """
    n, ob_dim = ob_no.shape
    assert batch_tile % 128 == 0, "batch_tile must be a multiple of 128"

    params = fuse_rnd_params(f_params, f_hat_params)
    n_linear = len(params) // 2

    n_tiles = pl.cdiv(n, batch_tile)                 # keep >= 2 for v7x (2 TCs)
    n_pad = n_tiles * batch_tile
    if n_pad != n:
        ob_no = jnp.pad(ob_no, ((0, n_pad - n), (0, 0)))

    kernel = _make_rnd_kernel(n_linear, compute_dtype)

    x_spec = pl.BlockSpec((batch_tile, ob_dim), lambda i: (i, 0))

    def full_spec(p):
        # Small params, constant block index -> resident in VMEM across the grid.
        # NOTE: with non-trivial param sizes, add pipeline_mode=pl.Buffered(1) here
        # to drop the redundant second buffer (block index never changes).
        return pl.BlockSpec(p.shape, lambda i: (0,) * p.ndim)

    param_specs = [full_spec(p) for p in params]

    # Lane-dense output: batch mapped to lanes -> unmasked vector stores.
    out_spec = pl.BlockSpec((1, batch_tile), lambda i: (0, i))

    out = pl.pallas_call(
        kernel,
        out_shape=jax.ShapeDtypeStruct((1, n_pad), jnp.float32),
        grid_spec=pltpu.PrefetchScalarGridSpec(
            num_scalar_prefetch=0,
            grid=(n_tiles,),
            in_specs=[x_spec] + param_specs,
            out_specs=out_spec,
        ),
        compiler_params=pltpu.CompilerParams(
            dimension_semantics=("parallel",),
            vmem_limit_bytes=_vmem_limit_bytes(ob_dim, batch_tile, params),
        ),
    )(ob_no, *params)

    return out[0, :n]


# ---------------------------------------------------------------------------
# Parameter construction + pure-JAX reference
# ---------------------------------------------------------------------------
def build_mlp_params(key, in_dim, out_dim, n_layers, size, init):
    """Mirror ptu.build_mlp shapes: n_layers hidden layers of `size`, then an
    output Linear. init='uniform' (init_method_1) or 'normal' (init_method_2).
    Weights stored as (in, out), biases as (1, out)."""
    dims = [in_dim] + [size] * n_layers + [out_dim]
    params = []
    for d_in, d_out in zip(dims[:-1], dims[1:]):
        key, kw, kb = jax.random.split(key, 3)
        if init == "uniform":
            w = jax.random.uniform(kw, (d_in, d_out), dtype=jnp.float32)
            b = jax.random.uniform(kb, (1, d_out), dtype=jnp.float32)
        else:
            w = jax.random.normal(kw, (d_in, d_out), dtype=jnp.float32)
            b = jax.random.normal(kb, (1, d_out), dtype=jnp.float32)
        params += [w, b]
    return params, key


def reference_forward(ob_no, f_params, f_hat_params):
    """Pure-JAX reference of the PyTorch forward (hash=False branch)."""
    def mlp(x, params):
        n_linear = len(params) // 2
        h = x
        for li in range(n_linear):
            h = h @ params[2 * li] + params[2 * li + 1]
            if li < n_linear - 1:
                h = jnp.tanh(h)
        return h
    f_out = mlp(ob_no, f_params)
    g_out = mlp(ob_no, f_hat_params)
    return jnp.mean((f_out - g_out) ** 2, axis=1)


if __name__ == "__main__":
    # Small hparams consistent with RNDModel.__init__:
    #   ob_dim=4, rnd_output_size=8, rnd_n_layers=2, rnd_size=32, hash=False
    ob_dim = 4
    output_size = 8
    n_layers = 2
    size = 32
    batch = 500          # ragged on purpose: exercises padding; grid = 2 (good for v7x)

    key = jax.random.PRNGKey(0)
    key, kx = jax.random.split(key)
    ob_no = jax.random.normal(kx, (batch, ob_dim), dtype=jnp.float32)

    # f: init_method_1 (uniform), f_hat: init_method_2 (normal)
    f_params, key = build_mlp_params(key, ob_dim, output_size, n_layers, size, "uniform")
    f_hat_params, key = build_mlp_params(key, ob_dim, output_size, n_layers, size, "normal")

    error = rnd_forward(ob_no, f_params, f_hat_params, batch_tile=256)
    error = jax.block_until_ready(error)

    ref = reference_forward(ob_no, f_params, f_hat_params)
    assert error.shape == (batch,)
    assert jnp.allclose(error, ref, atol=1e-4, rtol=1e-4), (error, ref)

    # TODO(synk): the hash=True branch (count-based bonus via a python defaultdict over
    # rounded codes) is host-side stateful bookkeeping with no Pallas equivalent.
    print("KERNEL_OK")
</pallas_src>

<mosaic_0001>
module attributes {stable_mosaic.version = 11 : i64} {
  func.func @kernel(%arg0: i32, %arg1: memref<256x4xf32, #tpu.memory_space<vmem>>, %arg2: memref<4x64xf32, #tpu.memory_space<vmem>>, %arg3: memref<1x64xf32, #tpu.memory_space<vmem>>, %arg4: memref<64x64xf32, #tpu.memory_space<vmem>>, %arg5: memref<1x64xf32, #tpu.memory_space<vmem>>, %arg6: memref<64x8xf32, #tpu.memory_space<vmem>>, %arg7: memref<1x8xf32, #tpu.memory_space<vmem>>, %arg8: memref<1x256xf32, #tpu.memory_space<vmem>>) attributes {dimension_semantics = [#tpu.dimension_semantics<parallel>], iteration_bounds = array<i64: 2>, scalar_prefetch = 0 : i64, scratch_operands = 0 : i64, tpu.core_type = #tpu.core_type<tc>, window_params = [{transform_indices = @transform_0, window_bounds = array<i64: 256, 4>}, {pipeline_mode = #tpu.pipeline_mode<synchronous>, transform_indices = @transform_1, window_bounds = array<i64: 4, 64>}, {pipeline_mode = #tpu.pipeline_mode<synchronous>, transform_indices = @transform_2, window_bounds = array<i64: 1, 64>}, {pipeline_mode = #tpu.pipeline_mode<synchronous>, transform_indices = @transform_3, window_bounds = array<i64: 64, 64>}, {pipeline_mode = #tpu.pipeline_mode<synchronous>, transform_indices = @transform_4, window_bounds = array<i64: 1, 64>}, {pipeline_mode = #tpu.pipeline_mode<synchronous>, transform_indices = @transform_5, window_bounds = array<i64: 64, 8>}, {pipeline_mode = #tpu.pipeline_mode<synchronous>, transform_indices = @transform_6, window_bounds = array<i64: 1, 8>}, {transform_indices = @transform_7, window_bounds = array<i64: 1, 256>}]} {
    %c0 = arith.constant 0 : index
    %c0_0 = arith.constant 0 : index
    %0 = vector.load %arg1[%c0, %c0_0] : memref<256x4xf32, #tpu.memory_space<vmem>>, vector<256x4xf32>
    %c0_1 = arith.constant 0 : index
    %c0_2 = arith.constant 0 : index
    %1 = vector.load %arg2[%c0_1, %c0_2] : memref<4x64xf32, #tpu.memory_space<vmem>>, vector<4x64xf32>
    %c0_3 = arith.constant 0 : index
    %c0_4 = arith.constant 0 : index
    %2 = vector.load %arg3[%c0_3, %c0_4] : memref<1x64xf32, #tpu.memory_space<vmem>>, vector<1x64xf32>
    %cst = arith.constant dense<0.000000e+00> : vector<256x64xf32>
    %3 = tpu.matmul %0, %1, %cst {dimension_numbers = #tpu.dot_dimension_numbers<[1], [0], [0], [1], [0, 0, 1, 1], [], []>} : vector<256x4xf32>, vector<4x64xf32>, vector<256x64xf32> -> vector<256x64xf32>
    %4 = vector.broadcast %2 : vector<1x64xf32> to vector<256x64xf32>
    %5 = arith.addf %3, %4 : vector<256x64xf32>
    %6 = math.tanh %5 : vector<256x64xf32>
    %c0_5 = arith.constant 0 : index
    %c0_6 = arith.constant 0 : index
    %7 = vector.load %arg4[%c0_5, %c0_6] : memref<64x64xf32, #tpu.memory_space<vmem>>, vector<64x64xf32>
    %c0_7 = arith.constant 0 : index
    %c0_8 = arith.constant 0 : index
    %8 = vector.load %arg5[%c0_7, %c0_8] : memref<1x64xf32, #tpu.memory_space<vmem>>, vector<1x64xf32>
    %cst_9 = arith.constant dense<0.000000e+00> : vector<256x64xf32>
    %9 = tpu.matmul %6, %7, %cst_9 {dimension_numbers = #tpu.dot_dimension_numbers<[1], [0], [0], [1], [0, 0, 1, 1], [], []>} : vector<256x64xf32>, vector<64x64xf32>, vector<256x64xf32> -> vector<256x64xf32>
    %10 = vector.broadcast %8 : vector<1x64xf32> to vector<256x64xf32>
    %11 = arith.addf %9, %10 : vector<256x64xf32>
    %12 = math.tanh %11 : vector<256x64xf32>
    %c0_10 = arith.constant 0 : index
    %c0_11 = arith.constant 0 : index
    %13 = vector.load %arg6[%c0_10, %c0_11] : memref<64x8xf32, #tpu.memory_space<vmem>>, vector<64x8xf32>
    %c0_12 = arith.constant 0 : index
    %c0_13 = arith.constant 0 : index
    %14 = vector.load %arg7[%c0_12, %c0_13] : memref<1x8xf32, #tpu.memory_space<vmem>>, vector<1x8xf32>
    %cst_14 = arith.constant dense<0.000000e+00> : vector<256x8xf32>
    %15 = tpu.matmul %12, %13, %cst_14 {dimension_numbers = #tpu.dot_dimension_numbers<[1], [0], [0], [1], [0, 0, 1, 1], [], []>} : vector<256x64xf32>, vector<64x8xf32>, vector<256x8xf32> -> vector<256x8xf32>
    %16 = vector.broadcast %14 : vector<1x8xf32> to vector<256x8xf32>
    %17 = arith.addf %15, %16 : vector<256x8xf32>
    %18 = arith.mulf %17, %17 : vector<256x8xf32>
    %cst_15 = arith.constant dense<0.000000e+00> : vector<256xf32>
    %19 = vector.multi_reduction <add>, %18, %cst_15 [1] : vector<256x8xf32> to vector<256xf32>
    %cst_16 = arith.constant 8.000000e+00 : f32
    %20 = vector.broadcast %cst_16 : f32 to vector<256xf32>
    %21 = arith.divf %19, %20 : vector<256xf32>
    %22 = vector.shape_cast %21 : vector<256xf32> to vector<1x256xf32>
    %c0_17 = arith.constant 0 : index
    %c0_18 = arith.constant 0 : index
    %23 = vector.load %arg8[%c0_17, %c0_18] : memref<1x256xf32, #tpu.memory_space<vmem>>, vector<1x256xf32>
    tpu.vector_store %arg8[%c0_17, %c0_18], %22 {strides = array<i32>} : memref<1x256xf32, #tpu.memory_space<vmem>>, vector<1x256xf32>,
    return
  }
  func.func @transform_0(%arg0: i32) -> (i32, i32) {
    %c0_i32 = arith.constant 0 : i32
    %c0_i32_0 = arith.constant 0 : i32
    return %arg0, %c0_i32 : i32, i32
  }
  func.func @transform_1(%arg0: i32) -> (i32, i32) {
    %c0_i32 = arith.constant 0 : i32
    %c0_i32_0 = arith.constant 0 : i32
    %c0_i32_1 = arith.constant 0 : i32
    return %c0_i32, %c0_i32_0 : i32, i32
  }
  func.func @transform_2(%arg0: i32) -> (i32, i32) {
    %c0_i32 = arith.constant 0 : i32
    %c0_i32_0 = arith.constant 0 : i32
    %c0_i32_1 = arith.constant 0 : i32
    return %c0_i32, %c0_i32_0 : i32, i32
  }
  func.func @transform_3(%arg0: i32) -> (i32, i32) {
    %c0_i32 = arith.constant 0 : i32
    %c0_i32_0 = arith.constant 0 : i32
    %c0_i32_1 = arith.constant 0 : i32
    return %c0_i32, %c0_i32_0 : i32, i32
  }
  func.func @transform_4(%arg0: i32) -> (i32, i32) {
    %c0_i32 = arith.constant 0 : i32
    %c0_i32_0 = arith.constant 0 : i32
    %c0_i32_1 = arith.constant 0 : i32
    return %c0_i32, %c0_i32_0 : i32, i32
  }
  func.func @transform_5(%arg0: i32) -> (i32, i32) {
    %c0_i32 = arith.constant 0 : i32
    %c0_i32_0 = arith.constant 0 : i32
    %c0_i32_1 = arith.constant 0 : i32
    return %c0_i32, %c0_i32_0 : i32, i32
  }
  func.func @transform_6(%arg0: i32) -> (i32, i32) {
    %c0_i32 = arith.constant 0 : i32
    %c0_i32_0 = arith.constant 0 : i32
    %c0_i32_1 = arith.constant 0 : i32
    return %c0_i32, %c0_i32_0 : i32, i32
  }
  func.func @transform_7(%arg0: i32) -> (i32, i32) {
    %c0_i32 = arith.constant 0 : i32
    %c0_i32_0 = arith.constant 0 : i32
    return %c0_i32, %arg0 : i32, i32
  }
}

</mosaic_0001>

<bundles_post_ra>
// kernel: tpu_custom_call.1
= control target key start
LH: loop header
LB: loop body
LE: loop exit
PB: predicated region body
PF: predicated region fallthrough
CT: control target
= control target key end

     0   :  { %12 = vsyncpa [#allocation3], 0  ;;  %s3109_s0 = inlined_call_operand.vmem [shape: f32[512,4], index: 0, kind: input, shape index: {}]   ;;  %s3110_s1 = inlined_call_operand.vmem [shape: f32[4,64], index: 1, kind: input, shape index: {}]   ;;  %s3111_s2 = inlined_call_operand.vmem [shape: f32[1,64], index: 2, kind: input, shape index: {}]   ;;  %s3112_s3 = inlined_call_operand.vmem [shape: f32[64,64], index: 3, kind: input, shape index: {}]   ;;  %s3113_s4 = inlined_call_operand.vmem [shape: f32[1,64], index: 4, kind: input, shape index: {}]   ;;  %s3114_s5 = inlined_call_operand.vmem [shape: f32[64,8], index: 5, kind: input, shape index: {}]   ;;  %s3115_s6 = inlined_call_operand.vmem [shape: f32[1,8], index: 6, kind: input, shape index: {}]   ;;  %s3116_s7 = inlined_call_operand.hbm [shape: f32[1,512], index: 7, kind: output, shape index: {}]  }
   0x1   :  { %14 = vsyncpa [#allocation3 + $0x1], 0  ;;  %s2473_s24 = smov 0   ;;  %s2475_s25 = smov 0  }
   0x2   :  { %s2477_s26 = smov 0   ;;  %s2479_s27 = smov 0  }
   0x3 LB: > { %s2494_s28 = sadd.s32 4294967295, %s2429_s27   ;;  %s2063_s29 = sadd.s32 4294967294, %s2429_s27   ;;  %s2429_s27 = sphi %s2479_s27, %s3122_s27   ;;  %s2425_s26 = sphi %s2477_s26, %s3121_s26   ;;  %s2421_s25 = sphi %s2475_s25, %s3120_s25   ;;  %s2417_s24 = sphi %s2473_s24, %s3119_s24  }
   0x4   : > { %s2498_s30 = sadd.s32 1, %s2429_s27   ;;  %s179_s8 = sadd.s32 1, %s2425_s26 }
   0x5   : > { %s176_s9 = ssub.s32 %s2429_s27, %s2498_s30  ;;  %p189_p0 = scmp.ne.s32.totalorder %s2425_s26, %s2421_s25 }
   0x6   : > { %p177_p1 = scmp.eq.s32.totalorder %s176_s9, 0  ;;  %p190_p2 = scmp.eq.s32.totalorder %s2494_s28, 1 }
   0x7   : > { %p195_p3 = scmp.ne.s32.totalorder %s2421_s25, %s2417_s24  ;;  %p196_p4 = scmp.eq.s32.totalorder %s2063_s29, 1 }
   0x8   : > { %s2509_s10 = scalar_select %p177_p1, %s2425_s26, %s179_s8  }
   0x9   : > { %p2511_p5 = por %p190_p2, %p189_p0  ;;  %p2515_p6 = por %p196_p4, %p195_p3 }
   0xa   : > { %p2066_p7 = scmp.ge.s32.totalorder %s2429_s27, 1  ;;  %p241_p8 = scmp.lt.s32.totalorder %s2429_s27, 3 }
   0xc   : > { %p242_p9 = pnand %p2066_p7, %p241_p8 }
   0xd   : > { %s2068_s15 = sshll.u32 (!%p242_p9), %s2494_s28, 5  ;;  %s270_s22 = sand.u32 (!%p242_p9), 1, %s2421_s25  }
   0xe   : > { %245 = sbr.rel (%p242_p9) target bundleno = 1206 (0x4b6), region = 48  ;;  %p274_p10 = scmp.lt.s32.totalorder (!%p242_p9), %s2068_s15, 63 }
   0xf   : > { %s2067_s23 = sshll.u32 (!%p242_p9), %s270_s22, 1  ;;  %s2168_s29 = sshll.u32 (!%p242_p9), %s2494_s28, 1 }
  0x10   : > { %s1999_s13 = scalar_lea.hbm (!%p242_p9), %s3116_s7, %s2168_s29  ;;  %s272_s28 = scalar_lea.vmem (!%p242_p9), [#allocation2], %s2067_s23 }
  0x11   : > { %s2001_s14 = sshll.u32 (!%p242_p9), %s272_s28, 4  ;;  %s2387_s21 = scalar_lea.hbm (!%p242_p9), %s3116_s7, 4  ;;  %s2002_s14 = int_to_ptr.vmem [resolvable:$true] %s2001_s14 }
  0x13   : > { %v312_v0 = vld [vmem:[%s3110_s1] sm:$0xf]  ;;  %vm414_vm0 = vcmask 1043456   ;;  %s3124_s15 = smov (!%p274_p10, %s2068_s15), 63  ;;  %vm317_vm1 = vcmask 31744   ;;  %v570_v13 = vld [vmem:[%s3112_s3 + $0x38] sm:$0xff] }
  0x14   : > { %2070 = vmatpush.msk.msra.mxu0 %vm414_vm0, %v312_v0  ;;  %2171 = vmatpush.msk.msra.mxu3 %vm414_vm0, %v312_v0  ;;  %s2069_s16 = sshll.u32 %s3124_s15, 3  ;;  %v569_v14 = vld [vmem:[%s3112_s3 + $0x30] sm:$0xff]  ;;  %v568_v15 = vld [vmem:[%s3112_s3 + $0x28] sm:$0xff]  ;;  %v567_v17 = vld [vmem:[%s3112_s3 + $0x20] sm:$0xff]  ;;  %vm575_vm2 = vcmask 523264   ;;  %vm1070_vm3 = vcmask 64512  }
  0x15   : > { %s2528_s19 = scalar_lea.vmem %s3109_s0, %s2069_s16  ;;  %680 = vmatpush.msra.mxu1 %v570_v13  ;;  %v566_v18 = vld [vmem:[%s3112_s3 + $0x18] sm:$0xff]  ;;  %v565_v19 = vld [vmem:[%s3112_s3 + $0x10] sm:$0xff]  ;;  %v564_v20 = vld [vmem:[%s3112_s3 + $0x8] sm:$0xff]  ;;  %vm1890_vm5 = vcmask 130112   ;;  %vm1894_vm6 = vcmask 195712   ;;  %vm1898_vm7 = vcmask 261312  }
  0x16   : > { %v280_v1 = vld [vmem:[%s2528_s19] sm:$0xff]  ;;  %v281_v2 = vld [vmem:[%s2528_s19 + $0x8] sm:$0xff]  ;;  %v282_v3 = vld [vmem:[%s2528_s19 + $0x10] sm:$0xff]  ;;  %2172 = vmatpush.msrb.mxu3 %v570_v13  ;;  %vm1902_vm8 = vcmask 326912   ;;  %vm1906_vm9 = vcmask 392512   ;;  %vm1910_vm10 = vcmask 458112  }
  0x17   : > { %2071 = vmatmul.msk.f32.vlgmr.msra.gmra.mxu0 %vm317_vm1, %v280_v1  ;;  %v283_v4 = vld [vmem:[%s2528_s19 + $0x18] sm:$0xff]  ;;  %v284_v5 = vld [vmem:[%s2528_s19 + $0x20] sm:$0xff]  ;;  %v285_v6 = vld [vmem:[%s2528_s19 + $0x28] sm:$0xff]  ;;  %681 = vmatpush.msra.mxu1 %v569_v14  ;;  %vm1914_vm11 = vcmask 523712   ;;  %vm1918_vm12 = vcmask 589312   ;;  %vm1922_vm13 = vcmask 654912  }
  0x18   : > { %v286_v7 = vld [vmem:[%s2528_s19 + $0x30] sm:$0xff]  ;;  %v287_v8 = vld [vmem:[%s2528_s19 + $0x38] sm:$0xff]  ;;  %v288_v9 = vld [vmem:[%s2528_s19 + $0x40] sm:$0xff]  ;;  %2173 = vmatpush.msrb.mxu3 %v569_v14  ;;  %vm1926_vm14 = vcmask 720512   ;;  %vm1930_vm15 = vcmask 786112   ;;  %vm1934_vm0 = vcmask 851712  }
  0x19   : > { %v289_v10 = vld [vmem:[%s2528_s19 + $0x48] sm:$0xff]  ;;  %v290_v11 = vld [vmem:[%s2528_s19 + $0x50] sm:$0xff]  ;;  %v291_v12 = vld [vmem:[%s2528_s19 + $0x58] sm:$0xff]  ;;  %682 = vmatpush.msra.mxu1 %v568_v15  ;;  %s2003_s15 = sshll.u32 %s1999_s13, 4  ;;  %s2004_s15 = int_to_ptr.hbm [resolvable:$true] %s2003_s15 }
  0x1a   : > { %v292_v16 = vld [vmem:[%s2528_s19 + $0x60] sm:$0xff]  ;;  %2174 = vmatpush.msrb.mxu3 %v568_v15  ;;  %v293_v21 = vld [vmem:[%s2528_s19 + $0x68] sm:$0xff]  ;;  %v294_v23 = vld [vmem:[%s2528_s19 + $0x70] sm:$0xff]  ;;  %s2381_s16 = sshra.s32 %s2004_s15, 4  ;;  %s2382_s16 = int_to_ptr.hbm [resolvable:$true] %s2381_s16 }
  0x1b   : > { %683 = vmatpush.msra.mxu1 %v567_v17  ;;  %v563_v22 = vld [vmem:[%s3112_s3] sm:$0xff]  ;;  %v295_v24 = vld [vmem:[%s2528_s19 + $0x78] sm:$0xff]  ;;  %v297_v30 = vld [vmem:[%s2528_s19 + $0x88] sm:$0xff]  ;;  %s2383_s17 = scalar_lea.hbm %s2382_s16, 2  ;;  %p2388_p0 = scmp.lt.s32.totalorder %s2382_s16, %s3116_s7 }
  0x1c   : > { %2175 = vmatpush.msrb.mxu3 %v567_v17  ;;  %v2589_v25 = vld [vmem:[%s3111_s2] ss:$0 sm:$0xff]  ;;  %v298_v34 = vld [vmem:[%s2528_s19 + $0x90] sm:$0xff]  ;;  %v299_v38 = vld [vmem:[%s2528_s19 + $0x98] sm:$0xff]  ;;  %p2384_p11 = scmp.ne.s32.totalorder %s2382_s16, %s2383_s17  ;;  %p2389_p1 = scmp.lt.s32.totalorder %s2387_s21, %s2383_s17 }
  0x1d   : > { %684 = vmatpush.msra.mxu1 %v566_v18  ;;  %v296_v27 = vld [vmem:[%s2528_s19 + $0x80] sm:$0xff]  ;;  %v301_v46 = vld [vmem:[%s2528_s19 + $0xa8] sm:$0xff]  ;;  %v302_v59 = vld [vmem:[%s2528_s19 + $0xb0] sm:$0xff] }
  0x1e   : > { %2176 = vmatpush.msrb.mxu3 %v566_v18  ;;  %v300_v42 = vld [vmem:[%s2528_s19 + $0xa0] sm:$0xff]  ;;  %v303_v63 = vld [vmem:[%s2528_s19 + $0xb8] sm:$0xff]  ;;  %v819_v17 = vld [vmem:[%s3114_s5 + $0x10] sm:$0xff]  ;;  %p2385_p12 = pnand %p2384_p11, %p2511_p5  ;;  %p2390_p2 = por %p2389_p1, %p2388_p0 }
  0x1f   : > { %2072 = vmatmul.msk.f32.gmra.mxu0 %vm317_vm1, %v281_v2  ;;  %685 = vmatpush.msra.mxu1 %v565_v19  ;;  %v818_v18 = vld [vmem:[%s3114_s5 + $0x8] sm:$0xff] }
  0x20   : > { %2177 = vmatpush.msrb.mxu3 %v565_v19  ;;  %v817_v19 = vld [vmem:[%s3114_s5] sm:$0xff]  ;;  %p2386_p13 = pneg %p2385_p12 }
  0x21   : > { %686 = vmatpush.msra.mxu1 %v564_v20 }
  0x22   : > { %2178 = vmatpush.msrb.mxu3 %v564_v20  ;;  %p2391_p3 = pnand %p2390_p2, %p2386_p13 }
  0x23   : > { %687 = vmatpush.msra.mxu1 %v563_v22 }
  0x24   : > { %2179 = vmatpush.msrb.mxu3 %v563_v22 }
  0x27   : > { %2073 = vmatmul.msk.f32.gmra.mxu0 %vm317_vm1, %v282_v3  ;;  %v304_v3 = vld [vmem:[%s2528_s19 + $0xc0] sm:$0xff] }
  0x2f   : > { %2074 = vmatmul.msk.f32.gmra.mxu0 %vm317_vm1, %v283_v4 }
  0x37   : > { %2075 = vmatmul.msk.f32.gmra.mxu0 %vm317_vm1, %v284_v5 }
  0x3f   : > { %2076 = vmatmul.msk.f32.gmra.mxu0 %vm317_vm1, %v285_v6 }
  0x47   : > { %2077 = vmatmul.msk.f32.gmra.mxu0 %vm317_vm1, %v286_v7 }
  0x4f   : > { %2078 = vmatmul.msk.f32.gmra.mxu0 %vm317_vm1, %v287_v8 }
  0x57   : > { %2079 = vmatmul.msk.f32.gmra.mxu0 %vm317_vm1, %v288_v9  ;;  %v824_v9 = vld [vmem:[%s3114_s5 + $0x38] sm:$0xff] }
  0x58   : > { %933 = vmatpush.msra.mxu2 %v824_v9 }
  0x5f   : > { %2080 = vmatmul.msk.f32.gmra.mxu0 %vm317_vm1, %v289_v10  ;;  %v823_v10 = vld [vmem:[%s3114_s5 + $0x30] sm:$0xff] }
  0x60   : > { %934 = vmatpush.msra.mxu2 %v823_v10 }
  0x67   : > { %2081 = vmatmul.msk.f32.gmra.mxu0 %vm317_vm1, %v290_v11  ;;  %v822_v11 = vld [vmem:[%s3114_s5 + $0x28] sm:$0xff] }
  0x68   : > { %935 = vmatpush.msra.mxu2 %v822_v11 }
  0x6f   : > { %2082 = vmatmul.msk.f32.gmra.mxu0 %vm317_vm1, %v291_v12  ;;  %v821_v12 = vld [vmem:[%s3114_s5 + $0x20] sm:$0xff] }
  0x70   : > { %936 = vmatpush.msra.mxu2 %v821_v12 }
  0x77   : > { %2083 = vmatmul.msk.f32.gmra.mxu0 %vm317_vm1, %v292_v16  ;;  %v820_v16 = vld [vmem:[%s3114_s5 + $0x18] sm:$0xff] }
  0x78   : > { %937 = vmatpush.msra.mxu2 %v820_v16 }
  0x7a   : > { %938 = vmatpush.msra.mxu2 %v819_v17 }
  0x7c   : > { %939 = vmatpush.msra.mxu2 %v818_v18 }
  0x7e   : > { %940 = vmatpush.msra.mxu2 %v817_v19 }
  0x7f   : > { %2084 = vmatmul.msk.f32.gmra.mxu0 %vm317_vm1, %v293_v21 }
  0x87   : > { %2085 = vmatmul.msk.f32.gmra.mxu0 %vm317_vm1, %v294_v23 }
  0x8f   : > { %2086 = vmatmul.msk.f32.gmra.mxu0 %vm317_vm1, %v295_v24 }
  0x94   : > { %v435_v26 = vpop.f32.mrf.mxu0 }
  0x95   : > { %v436_v28 = vadd.f32 %v2589_v25, %v435_v26 }
  0x97   : > { %2235 = vtanh.f32 %v436_v28  ;;  %2087 = vmatmul.msk.f32.gmra.mxu0 %vm317_vm1, %v296_v27  ;;  %v305_v28 = vld [vmem:[%s2528_s19 + $0xc8] sm:$0xff] }
  0x98   : > { %2096 = vmatmul.msk.f32.vlgmr.msra.gmra.mxu3 %vm317_vm1, %v305_v28  ;;  %v311_v28 = vld [vmem:[%s2528_s19 + $0xf8] sm:$0xff] }
  0x99   : > { %2180 = vmatpush.msra.mxu3 %v824_v9 }
  0x9b   : > { %2181 = vmatpush.msra.mxu3 %v823_v10  ;;  %v309_v10 = vld [vmem:[%s2528_s19 + $0xe8] sm:$0xff] }
  0x9c   : > { %v438_v29 = vpop.f32.mrf.mxu0 }
  0x9d   : > { %v2236_v31 = vpop.eup %2235  ;;  %v439_v32 = vadd.f32 %v2589_v25, %v438_v29  ;;  %2182 = vmatpush.msra.mxu3 %v822_v11 }
  0x9e   : > { %2103 = vmatmul.msk.f32.vlgmr.msra.gmra.mxu1 %vm575_vm2, %v2236_v31  ;;  %v2671_v31 = vld [vmem:[%s3113_s4] ss:$0 sm:$0xff] }
  0x9f   : > { %2237 = vtanh.f32 %v439_v32  ;;  %2088 = vmatmul.msk.f32.gmra.mxu0 %vm317_vm1, %v297_v30  ;;  %2183 = vmatpush.msra.mxu3 %v821_v12 }
  0xa1   : > { %2184 = vmatpush.msra.mxu3 %v820_v16  ;;  %v310_v16 = vld [vmem:[%s2528_s19 + $0xf0] sm:$0xff] }
  0xa3   : > { %2185 = vmatpush.msra.mxu3 %v819_v17 }
  0xa4   : > { %v441_v33 = vpop.f32.mrf.mxu0 }
  0xa5   : > { %v2238_v35 = vpop.eup %2237  ;;  %v442_v36 = vadd.f32 %v2589_v25, %v441_v33  ;;  %2186 = vmatpush.msra.mxu3 %v818_v18 }
  0xa6   : > { %2104 = vmatmul.msk.f32.gmra.mxu1 %vm575_vm2, %v2238_v35  ;;  %v306_v35 = vld [vmem:[%s2528_s19 + $0xd0] sm:$0xff] }
  0xa7   : > { %2239 = vtanh.f32 %v442_v36  ;;  %2089 = vmatmul.msk.f32.gmra.mxu0 %vm317_vm1, %v298_v34  ;;  %2097 = vmatmul.msk.f32.gmra.mxu3 %vm317_vm1, %v306_v35 }
  0xa8   : > { %2187 = vmatpush.msra.mxu3 %v817_v19 }
  0xac   : > { %v444_v37 = vpop.f32.mrf.mxu0 }
  0xad   : > { %v2240_v39 = vpop.eup %2239  ;;  %v445_v40 = vadd.f32 %v2589_v25, %v444_v37 }
  0xae   : > { %2105 = vmatmul.msk.f32.gmra.mxu1 %vm575_vm2, %v2240_v39 }
  0xaf   : > { %2241 = vtanh.f32 %v445_v40  ;;  %2090 = vmatmul.msk.f32.gmra.mxu0 %vm317_vm1, %v299_v38 }
  0xb4   : > { %v447_v41 = vpop.f32.mrf.mxu0 }
  0xb5   : > { %v2242_v43 = vpop.eup %2241  ;;  %v448_v44 = vadd.f32 %v2589_v25, %v447_v41 }
  0xb6   : > { %2106 = vmatmul.msk.f32.gmra.mxu1 %vm575_vm2, %v2242_v43 }
  0xb7   : > { %2243 = vtanh.f32 %v448_v44  ;;  %2091 = vmatmul.msk.f32.gmra.mxu0 %vm317_vm1, %v300_v42  ;;  %v307_v42 = vld [vmem:[%s2528_s19 + $0xd8] sm:$0xff] }
  0xb8   : > { %2098 = vmatmul.msk.f32.gmra.mxu3 %vm317_vm1, %v307_v42 }
  0xbc   : > { %v450_v45 = vpop.f32.mrf.mxu0 }
  0xbd   : > { %v2244_v47 = vpop.eup %2243  ;;  %v451_v48 = vadd.f32 %v2589_v25, %v450_v45 }
  0xbe   : > { %2107 = vmatmul.msk.f32.gmra.mxu1 %vm575_vm2, %v2244_v47 }
  0xbf   : > { %2245 = vtanh.f32 %v451_v48  ;;  %2092 = vmatmul.msk.f32.gmra.mxu0 %vm317_vm1, %v301_v46 }
  0xc4   : > { %v453_v49 = vpop.f32.mrf.mxu0 }
  0xc5   : > { %v2246_v50 = vpop.eup %2245  ;;  %v454_v51 = vadd.f32 %v2589_v25, %v453_v49 }
  0xc6   : > { %2108 = vmatmul.msk.f32.gmra.mxu1 %vm575_vm2, %v2246_v50 }
  0xc7   : > { %2247 = vtanh.f32 %v454_v51  ;;  %2093 = vmatmul.msk.f32.gmra.mxu0 %vm317_vm1, %v302_v59 }
  0xcc   : > { %v456_v52 = vpop.f32.mrf.mxu0 }
  0xcd   : > { %v2248_v53 = vpop.eup %2247  ;;  %v457_v54 = vadd.f32 %v2589_v25, %v456_v52 }
  0xce   : > { %2109 = vmatmul.msk.f32.gmra.mxu1 %vm575_vm2, %v2248_v53 }
  0xcf   : > { %2249 = vtanh.f32 %v457_v54  ;;  %2094 = vmatmul.msk.f32.gmra.mxu0 %vm317_vm1, %v303_v63 }
  0xd4   : > { %v459_v55 = vpop.f32.mrf.mxu0 }
  0xd5   : > { %v2250_v56 = vpop.eup %2249  ;;  %v460_v57 = vadd.f32 %v2589_v25, %v459_v55 }
  0xd6   : > { %2110 = vmatmul.msk.f32.gmra.mxu1 %vm575_vm2, %v2250_v56 }
  0xd7   : > { %2251 = vtanh.f32 %v460_v57  ;;  %2095 = vmatmul.msk.f32.gmra.mxu0 %vm317_vm1, %v304_v3 }
  0xdc   : > { %v462_v58 = vpop.f32.mrf.mxu0 }
  0xdd   : > { %v2252_v60 = vpop.eup %2251  ;;  %v463_v61 = vadd.f32 %v2589_v25, %v462_v58 }
  0xde   : > { %2111 = vmatmul.msk.f32.gmra.mxu1 %vm575_vm2, %v2252_v60 }
  0xdf   : > { %2253 = vtanh.f32 %v463_v61 }
  0xe4   : > { %v465_v62 = vpop.f32.mrf.mxu0 }
  0xe5   : > { %v2254_v0 = vpop.eup %2253  ;;  %v466_v1 = vadd.f32 %v2589_v25, %v465_v62 }
  0xe6   : > { %2112 = vmatmul.msk.f32.gmra.mxu1 %vm575_vm2, %v2254_v0 }
  0xe7   : > { %2255 = vtanh.f32 %v466_v1 }
  0xec   : > { %v468_v2 = vpop.f32.mrf.mxu0 }
  0xed   : > { %v2256_v4 = vpop.eup %2255  ;;  %v469_v5 = vadd.f32 %v2589_v25, %v468_v2 }
  0xee   : > { %2113 = vmatmul.msk.f32.gmra.mxu1 %vm575_vm2, %v2256_v4 }
  0xef   : > { %2257 = vtanh.f32 %v469_v5 }
  0xf4   : > { %v471_v6 = vpop.f32.mrf.mxu0 }
  0xf5   : > { %v2258_v7 = vpop.eup %2257  ;;  %v472_v8 = vadd.f32 %v2589_v25, %v471_v6  ;;  %v308_v6 = vld [vmem:[%s2528_s19 + $0xe0] sm:$0xff]  ;;  %s1989_s19 = scalar_lea.sflag [#allocation3], %s270_s22 }
  0xf6   : > { %2114 = vmatmul.msk.f32.gmra.mxu1 %vm575_vm2, %v2258_v7  ;;  %2099 = vmatmul.msk.f32.gmra.mxu3 %vm317_vm1, %v308_v6 }
  0xf7   : > { %2259 = vtanh.f32 %v472_v8 }
  0xfc   : > { %v474_v13 = vpop.f32.mrf.mxu0 }
  0xfd   : > { %v2260_v14 = vpop.eup %2259  ;;  %v475_v15 = vadd.f32 %v2589_v25, %v474_v13 }
  0xfe   : > { %2115 = vmatmul.msk.f32.gmra.mxu1 %vm575_vm2, %v2260_v14  ;;  %2100 = vmatmul.msk.f32.gmra.mxu3 %vm317_vm1, %v309_v10 }
  0xff   : > { %2261 = vtanh.f32 %v475_v15 }
 0x104   : > { %v477_v20 = vpop.f32.mrf.mxu0 }
 0x105   : > { %v2262_v21 = vpop.eup %2261  ;;  %v478_v22 = vadd.f32 %v2589_v25, %v477_v20 }
 0x106   : > { %2116 = vmatmul.msk.f32.gmra.mxu1 %vm575_vm2, %v2262_v21  ;;  %2101 = vmatmul.msk.f32.gmra.mxu3 %vm317_vm1, %v310_v16 }
 0x107   : > { %2263 = vtanh.f32 %v478_v22 }
 0x10c   : > { %v480_v23 = vpop.f32.mrf.mxu0 }
 0x10d   : > { %v2264_v24 = vpop.eup %2263  ;;  %v481_v26 = vadd.f32 %v2589_v25, %v480_v23 }
 0x10e   : > { %2117 = vmatmul.msk.f32.gmra.mxu1 %vm575_vm2, %v2264_v24  ;;  %2102 = vmatmul.msk.f32.gmra.mxu3 %vm317_vm1, %v311_v28  ;;  %vm1938_vm1 = vcmask 917312  }
 0x10f   : > { %2265 = vtanh.f32 %v481_v26 }
 0x114   : > { %v483_v27 = vpop.f32.mrf.mxu0 }
 0x115   : > { %v2266_v29 = vpop.eup %2265  ;;  %v484_v30 = vadd.f32 %v2589_v25, %v483_v27 }
 0x116   : > { %2118 = vmatmul.msk.f32.gmra.mxu1 %vm575_vm2, %v2266_v29 }
 0x117   : > { %2267 = vtanh.f32 %v484_v30 }
 0x11b   : > { %v689_v32 = vpop.f32.mrf.mxu1 }
 0x11c   : > { %v690_v33 = vadd.f32 %v2671_v31, %v689_v32  ;;  %v486_v34 = vpop.f32.mrf.mxu0 }
 0x11d   : > { %v2268_v36 = vpop.eup %2267  ;;  %v487_v37 = vadd.f32 %v2589_v25, %v486_v34 }
 0x11e   : > { %2269 = vtanh.f32 %v690_v33  ;;  %2119 = vmatmul.msk.f32.gmra.mxu1 %vm575_vm2, %v2268_v36 }
 0x11f   : > { %2271 = vtanh.f32 %v487_v37 }
 0x123   : > { %v692_v38 = vpop.f32.mrf.mxu1 }
 0x124   : > { %v2270_v39 = vpop.eup %2269  ;;  %v693_v40 = vadd.f32 %v2671_v31, %v692_v38  ;;  %v489_v41 = vpop.f32.mrf.mxu0 }
 0x125   : > { %v2272_v43 = vpop.eup %2271  ;;  %2135 = vmatmul.msk.f32.vlgmr.msra.gmra.mxu2 %vm575_vm2, %v2270_v39  ;;  %v490_v44 = vadd.f32 %v2589_v25, %v489_v41 }
 0x126   : > { %2273 = vtanh.f32 %v693_v40  ;;  %2120 = vmatmul.msk.f32.gmra.mxu1 %vm575_vm2, %v2272_v43 }
 0x127   : > { %2275 = vtanh.f32 %v490_v44 }
 0x12b   : > { %v695_v45 = vpop.f32.mrf.mxu1 }
 0x12c   : > { %v2274_v46 = vpop.eup %2273  ;;  %v696_v47 = vadd.f32 %v2671_v31, %v695_v45  ;;  %v492_v48 = vpop.f32.mrf.mxu0 }
 0x12d   : > { %v2276_v49 = vpop.eup %2275  ;;  %2136 = vmatmul.msk.f32.gmra.mxu2 %vm575_vm2, %v2274_v46  ;;  %v493_v50 = vadd.f32 %v2589_v25, %v492_v48  ;;  %v510_v48 = vpop.f32.mrf.mxu3 }
 0x12e   : > { %2277 = vtanh.f32 %v696_v47  ;;  %2121 = vmatmul.msk.f32.gmra.mxu1 %vm575_vm2, %v2276_v49  ;;  %v511_v49 = vadd.f32 %v2589_v25, %v510_v48 }
 0x12f   : > { %2279 = vtanh.f32 %v493_v50 }
 0x133   : > { %v698_v51 = vpop.f32.mrf.mxu1 }
 0x134   : > { %v2278_v52 = vpop.eup %2277  ;;  %v699_v53 = vadd.f32 %v2671_v31, %v698_v51  ;;  %v495_v54 = vpop.f32.mrf.mxu0 }
 0x135   : > { %v2280_v55 = vpop.eup %2279  ;;  %2137 = vmatmul.msk.f32.gmra.mxu2 %vm575_vm2, %v2278_v52  ;;  %v496_v56 = vadd.f32 %v2589_v25, %v495_v54 }
 0x136   : > { %2281 = vtanh.f32 %v699_v53  ;;  %2122 = vmatmul.msk.f32.gmra.mxu1 %vm575_vm2, %v2280_v55  ;;  %v513_v53 = vpop.f32.mrf.mxu3 }
 0x137   : > { %2283 = vtanh.f32 %v496_v56  ;;  %v514_v55 = vadd.f32 %v2589_v25, %v513_v53 }
 0x13b   : > { %v701_v57 = vpop.f32.mrf.mxu1 }
 0x13c   : > { %v2282_v58 = vpop.eup %2281  ;;  %v702_v59 = vadd.f32 %v2671_v31, %v701_v57  ;;  %v498_v60 = vpop.f32.mrf.mxu0 }
 0x13d   : > { %v2284_v61 = vpop.eup %2283  ;;  %2138 = vmatmul.msk.f32.gmra.mxu2 %vm575_vm2, %v2282_v58  ;;  %v499_v62 = vadd.f32 %v2589_v25, %v498_v60 }
 0x13e   : > { %2285 = vtanh.f32 %v702_v59  ;;  %2123 = vmatmul.msk.f32.gmra.mxu1 %vm575_vm2, %v2284_v61  ;;  %v2743_v59 = vld [vmem:[%s3115_s6] ss:$0 sm:$0xff]  ;;  %v516_v61 = vpop.f32.mrf.mxu3 }
 0x13f   : > { %2287 = vtanh.f32 %v499_v62 }
 0x143   : > { %v704_v63 = vpop.f32.mrf.mxu1 }
 0x144   : > { %v2286_v0 = vpop.eup %2285  ;;  %v705_v1 = vadd.f32 %v2671_v31, %v704_v63  ;;  %v501_v11 = vpop.f32.mrf.mxu0 }
 0x145   : > { %v2288_v2 = vpop.eup %2287  ;;  %2139 = vmatmul.msk.f32.gmra.mxu2 %vm575_vm2, %v2286_v0  ;;  %v502_v13 = vadd.f32 %v2589_v25, %v501_v11  ;;  %v517_v0 = vadd.f32 %v2589_v25, %v516_v61 }
 0x146   : > { %2289 = vtanh.f32 %v705_v1  ;;  %2124 = vmatmul.msk.f32.gmra.mxu1 %vm575_vm2, %v2288_v2 }
 0x14b   : > { %v707_v3 = vpop.f32.mrf.mxu1 }
 0x14c   : > { %v2290_v4 = vpop.eup %2289  ;;  %v708_v5 = vadd.f32 %v2671_v31, %v707_v3  ;;  %v504_v17 = vpop.f32.mrf.mxu0 }
 0x14d   : > { %2140 = vmatmul.msk.f32.gmra.mxu2 %vm575_vm2, %v2290_v4  ;;  %v505_v20 = vadd.f32 %v2589_v25, %v504_v17 }
 0x14e   : > { %2291 = vtanh.f32 %v708_v5 }
 0x153   : > { %v710_v7 = vpop.f32.mrf.mxu1 }
 0x154   : > { %v2292_v8 = vpop.eup %2291  ;;  %v711_v9 = vadd.f32 %v2671_v31, %v710_v7  ;;  %v507_v23 = vpop.f32.mrf.mxu0 }
 0x155   : > { %2141 = vmatmul.msk.f32.gmra.mxu2 %vm575_vm2, %v2292_v8  ;;  %v508_v27 = vadd.f32 %v2589_v25, %v507_v23 }
 0x156   : > { %2293 = vtanh.f32 %v711_v9 }
 0x157   : > { %2295 = vtanh.f32 %v502_v13 }
 0x15b   : > { %v713_v12 = vpop.f32.mrf.mxu1 }
 0x15c   : > { %v2294_v14 = vpop.eup %2293  ;;  %v714_v15 = vadd.f32 %v2671_v31, %v713_v12 }
 0x15d   : > { %2142 = vmatmul.msk.f32.gmra.mxu2 %vm575_vm2, %v2294_v14  ;;  %v2296_v18 = vpop.eup %2295 }
 0x15e   : > { %2297 = vtanh.f32 %v714_v15  ;;  %2125 = vmatmul.msk.f32.gmra.mxu1 %vm575_vm2, %v2296_v18 }
 0x15f   : > { %2299 = vtanh.f32 %v505_v20 }
 0x163   : > { %v716_v19 = vpop.f32.mrf.mxu1 }
 0x164   : > { %v2298_v21 = vpop.eup %2297  ;;  %v717_v22 = vadd.f32 %v2671_v31, %v716_v19 }
 0x165   : > { %2143 = vmatmul.msk.f32.gmra.mxu2 %vm575_vm2, %v2298_v21  ;;  %v2300_v24 = vpop.eup %2299 }
 0x166   : > { %2301 = vtanh.f32 %v717_v22  ;;  %2126 = vmatmul.msk.f32.gmra.mxu1 %vm575_vm2, %v2300_v24 }
 0x167   : > { %2303 = vtanh.f32 %v508_v27 }
 0x16b   : > { %v719_v26 = vpop.f32.mrf.mxu1 }
 0x16c   : > { %v2302_v29 = vpop.eup %2301  ;;  %v720_v30 = vadd.f32 %v2671_v31, %v719_v26 }
 0x16d   : > { %2144 = vmatmul.msk.f32.gmra.mxu2 %vm575_vm2, %v2302_v29  ;;  %v2304_v32 = vpop.eup %2303 }
 0x16e   : > { %2305 = vtanh.f32 %v720_v30  ;;  %2127 = vmatmul.msk.f32.vlgmr.msrb.gmra.mxu3 %vm575_vm2, %v2304_v32 }
 0x173   : > { %v722_v33 = vpop.f32.mrf.mxu1 }
 0x174   : > { %v2306_v34 = vpop.eup %2305  ;;  %v723_v35 = vadd.f32 %v2671_v31, %v722_v33 }
 0x175   : > { %2145 = vmatmul.msk.f32.gmra.mxu2 %vm575_vm2, %v2306_v34 }
 0x176   : > { %2307 = vtanh.f32 %v723_v35 }
 0x17b   : > { %v725_v36 = vpop.f32.mrf.mxu1 }
 0x17c   : > { %v2308_v37 = vpop.eup %2307  ;;  %v726_v38 = vadd.f32 %v2671_v31, %v725_v36 }
 0x17d   : > { %2146 = vmatmul.msk.f32.gmra.mxu2 %vm575_vm2, %v2308_v37 }
 0x17e   : > { %2309 = vtanh.f32 %v726_v38  ;;  %v519_v38 = vpop.f32.mrf.mxu3 }
 0x183   : > { %v728_v39 = vpop.f32.mrf.mxu1 }
 0x184   : > { %v2310_v40 = vpop.eup %2309  ;;  %v729_v41 = vadd.f32 %v2671_v31, %v728_v39  ;;  %v520_v39 = vadd.f32 %v2589_v25, %v519_v38 }
 0x185   : > { %2147 = vmatmul.msk.f32.gmra.mxu2 %vm575_vm2, %v2310_v40 }
 0x186   : > { %2311 = vtanh.f32 %v729_v41 }
 0x18b   : > { %v731_v42 = vpop.f32.mrf.mxu1 }
 0x18c   : > { %v2312_v43 = vpop.eup %2311  ;;  %v732_v44 = vadd.f32 %v2671_v31, %v731_v42 }
 0x18d   : > { %2148 = vmatmul.msk.f32.gmra.mxu2 %vm575_vm2, %v2312_v43 }
 0x18e   : > { %2313 = vtanh.f32 %v732_v44  ;;  %v522_v44 = vpop.f32.mrf.mxu3 }
 0x193   : > { %v734_v45 = vpop.f32.mrf.mxu1 }
 0x194   : > { %v2314_v46 = vpop.eup %2313  ;;  %v735_v47 = vadd.f32 %v2671_v31, %v734_v45 }
 0x195   : > { %2149 = vmatmul.msk.f32.gmra.mxu2 %vm575_vm2, %v2314_v46  ;;  %v523_v46 = vadd.f32 %v2589_v25, %v522_v44 }
 0x196   : > { %2315 = vtanh.f32 %v735_v47 }
 0x197   : > { %2317 = vtanh.f32 %v511_v49 }
 0x19b   : > { %v737_v50 = vpop.f32.mrf.mxu1 }
 0x19c   : > { %v2316_v51 = vpop.eup %2315  ;;  %v738_v52 = vadd.f32 %v2671_v31, %v737_v50 }
 0x19d   : > { %2150 = vmatmul.msk.f32.gmra.mxu2 %vm575_vm2, %v2316_v51  ;;  %v2318_v54 = vpop.eup %2317  ;;  %v525_v51 = vpop.f32.mrf.mxu3 }
 0x19e   : > { %2319 = vtanh.f32 %v738_v52  ;;  %2128 = vmatmul.msk.f32.gmra.mxu3 %vm575_vm2, %v2318_v54  ;;  %v526_v53 = vadd.f32 %v2589_v25, %v525_v51 }
 0x19f   : > { %2321 = vtanh.f32 %v514_v55 }
 0x1a3   : > { %v740_v56 = vpop.f32.mrf.mxu1 }
 0x1a4   : > { %v2320_v57 = vpop.eup %2319  ;;  %v741_v58 = vadd.f32 %v2671_v31, %v740_v56 }
 0x1a5   : > { %2151 = vmatmul.msk.f32.gmra.mxu2 %vm575_vm2, %v2320_v57  ;;  %v2322_v62 = vpop.eup %2321  ;;  %v528_v61 = vpop.f32.mrf.mxu3 }
 0x1a6   : > { %2323 = vtanh.f32 %v741_v58  ;;  %2129 = vmatmul.msk.f32.gmra.mxu3 %vm575_vm2, %v2322_v62 }
 0x1a7   : > { %2325 = vtanh.f32 %v517_v0 }
 0x1a8   : > { %v942_v60 = vpop.f32.mrf.mxu2 }
 0x1a9   : > { %v943_v63 = vadd.f32 %v2743_v59, %v942_v60 }
 0x1ab   : > { %v1038_v1 = vmul.f32 %v943_v63, %v943_v63  ;;  %v743_v2 = vpop.f32.mrf.mxu1  ;;  %v529_v63 = vadd.f32 %v2589_v25, %v528_v61 }
 0x1ac   : > { %v2324_v3 = vpop.eup %2323  ;;  %v744_v4 = vadd.f32 %v2671_v31, %v743_v2 }
 0x1ad   : > { %v1071_v5 = vsel %vm1070_vm3, %v1038_v1, 0.0  ;;  %2152 = vmatmul.msk.f32.gmra.mxu2 %vm575_vm2, %v2324_v3  ;;  %v2326_v7 = vpop.eup %2325 }
 0x1ae   : > { %1072 = vadd.xlane.f32.xlu0 %v1071_v5  ;;  %2327 = vtanh.f32 %v744_v4  ;;  %2130 = vmatmul.msk.f32.gmra.mxu3 %vm575_vm2, %v2326_v7 }
 0x1b0   : > { %v945_v6 = vpop.f32.mrf.mxu2 }
 0x1b1   : > { %v946_v8 = vadd.f32 %v2743_v59, %v945_v6 }
 0x1b3   : > { %v1039_v9 = vmul.f32 %v946_v8, %v946_v8  ;;  %v746_v10 = vpop.f32.mrf.mxu1 }
 0x1b4   : > { %v2328_v11 = vpop.eup %2327  ;;  %v747_v12 = vadd.f32 %v2671_v31, %v746_v10 }
 0x1b5   : > { %v1074_v13 = vsel %vm1070_vm3, %v1039_v9, 0.0  ;;  %2153 = vmatmul.msk.f32.gmra.mxu2 %vm575_vm2, %v2328_v11 }
 0x1b6   : > { %1075 = vadd.xlane.f32.xlu0 %v1074_v13  ;;  %2329 = vtanh.f32 %v747_v12 }
 0x1b8   : > { %v948_v14 = vpop.f32.mrf.mxu2 }
 0x1b9   : > { %v949_v15 = vadd.f32 %v2743_v59, %v948_v14 }
 0x1bb   : > { %v1040_v16 = vmul.f32 %v949_v15, %v949_v15  ;;  %v749_v17 = vpop.f32.mrf.mxu1 }
 0x1bc   : > { %v2330_v18 = vpop.eup %2329  ;;  %v750_v19 = vadd.f32 %v2671_v31, %v749_v17 }
 0x1bd   : > { %v1077_v20 = vsel %vm1070_vm3, %v1040_v16, 0.0  ;;  %2154 = vmatmul.msk.f32.gmra.mxu2 %vm575_vm2, %v2330_v18  ;;  %v2431_v16 = vmov 8.0  }
 0x1be   : > { %1078 = vadd.xlane.f32.xlu1 %v1077_v20  ;;  %2331 = vtanh.f32 %v750_v19 }
 0x1c0   : > { %v951_v21 = vpop.f32.mrf.mxu2 }
 0x1c1   : > { %v952_v22 = vadd.f32 %v2743_v59, %v951_v21 }
 0x1c3   : > { %v1041_v23 = vmul.f32 %v952_v22, %v952_v22  ;;  %v752_v24 = vpop.f32.mrf.mxu1 }
 0x1c4   : > { %v2332_v26 = vpop.eup %2331  ;;  %v753_v27 = vadd.f32 %v2671_v31, %v752_v24 }
 0x1c5   : > { %v1080_v28 = vsel %vm1070_vm3, %v1041_v23, 0.0  ;;  %2155 = vmatmul.msk.f32.gmra.mxu2 %vm575_vm2, %v2332_v26 }
 0x1c6   : > { %1081 = vadd.xlane.f32.xlu1 %v1080_v28  ;;  %2333 = vtanh.f32 %v753_v27 }
 0x1c7   : > { %2335 = vtanh.f32 %v520_v39 }
 0x1c8   : > { %v954_v29 = vpop.f32.mrf.mxu2  ;;  %2337 = vtanh.f32 %v523_v46 }
 0x1c9   : > { %v955_v30 = vadd.f32 %v2743_v59, %v954_v29  ;;  %2339 = vtanh.f32 %v526_v53 }
 0x1ca   : > { %2341 = vtanh.f32 %v529_v63 }
 0x1cb   : > { %v1042_v32 = vmul.f32 %v955_v30, %v955_v30 }
 0x1cc   : > { %v2334_v33 = vpop.eup %2333 }
 0x1cd   : > { %v1083_v34 = vsel %vm1070_vm3, %v1042_v32, 0.0  ;;  %2156 = vmatmul.msk.f32.gmra.mxu2 %vm575_vm2, %v2334_v33  ;;  %v2336_v45 = vpop.eup %2335 }
 0x1ce   : > { %1084 = vadd.xlane.f32.xlu2 %v1083_v34  ;;  %2131 = vmatmul.msk.f32.gmra.mxu3 %vm575_vm2, %v2336_v45  ;;  %v2338_v52 = vpop.eup %2337 }
 0x1cf   : > { %v2340_v58 = vpop.eup %2339 }
 0x1d0   : > { %v957_v35 = vpop.f32.mrf.mxu2  ;;  %v2342_v4 = vpop.eup %2341 }
 0x1d1   : > { %v958_v36 = vadd.f32 %v2743_v59, %v957_v35 }
 0x1d3   : > { %v1043_v37 = vmul.f32 %v958_v36, %v958_v36 }
 0x1d5   : > { %v1086_v40 = vsel %vm1070_vm3, %v1043_v37, 0.0 }
 0x1d6   : > { %1087 = vadd.xlane.f32.xlu2 %v1086_v40  ;;  %2132 = vmatmul.msk.f32.gmra.mxu3 %vm575_vm2, %v2338_v52 }
 0x1d8   : > { %v960_v41 = vpop.f32.mrf.mxu2 }
 0x1d9   : > { %v961_v42 = vadd.f32 %v2743_v59, %v960_v41 }
 0x1db   : > { %v1044_v43 = vmul.f32 %v961_v42, %v961_v42  ;;  %v755_v12 = vpop.f32.mrf.mxu1 }
 0x1dc   : > { %v756_v13 = vadd.f32 %v2671_v31, %v755_v12 }
 0x1dd   : > { %v1089_v47 = vsel %vm1070_vm3, %v1044_v43, 0.0 }
 0x1de   : > { %1090 = vadd.xlane.f32.xlu0 %v1089_v47  ;;  %2133 = vmatmul.msk.f32.gmra.mxu3 %vm575_vm2, %v2340_v58 }
 0x1e0   : > { %v963_v48 = vpop.f32.mrf.mxu2 }
 0x1e1   : > { %v964_v49 = vadd.f32 %v2743_v59, %v963_v48 }
 0x1e3   : > { %v1045_v50 = vmul.f32 %v964_v49, %v964_v49 }
 0x1e5   : > { %v1092_v54 = vsel %vm1070_vm3, %v1045_v50, 0.0 }
 0x1e6   : > { %1093 = vadd.xlane.f32.xlu1 %v1092_v54  ;;  %2134 = vmatmul.msk.f32.gmra.mxu3 %vm575_vm2, %v2342_v4 }
 0x1e8   : > { %v966_v55 = vpop.f32.mrf.mxu2 }
 0x1e9   : > { %v967_v56 = vadd.f32 %v2743_v59, %v966_v55  ;;  %v2432_v55 = vmov 0  }
 0x1ea   : > { %2229 = vset.pattern.permute.xlu2 %v2432_v55  ;;  %2230 = vset.pattern.permute.xlu0 %v2432_v55 }
 0x1eb   : > { %v1046_v57 = vmul.f32 %v967_v56, %v967_v56  ;;  %2231 = vset.pattern.permute.xlu1 %v2432_v55 }
 0x1ed   : > { %v1095_v60 = vsel %vm1070_vm3, %v1046_v57, 0.0 }
 0x1ee   : > { %1096 = vadd.xlane.f32.xlu2 %v1095_v60 }
 0x1f0   : > { %v969_v62 = vpop.f32.mrf.mxu2 }
 0x1f1   : > { %v970_v0 = vadd.f32 %v2743_v59, %v969_v62  ;;  %v761_v3 = vpop.f32.mrf.mxu3 }
 0x1f2   : > { %v762_v6 = vadd.f32 %v2671_v31, %v761_v3 }
 0x1f3   : > { %v1047_v1 = vmul.f32 %v970_v0, %v970_v0 }
 0x1f4   : > { %2343 = vtanh.f32 %v762_v6 }
 0x1f5   : > { %v1098_v2 = vsel %vm1070_vm3, %v1047_v1, 0.0  ;;  %2345 = vtanh.f32 %v756_v13 }
 0x1f6   : > { %1099 = vadd.xlane.f32.xlu0 %v1098_v2  ;;  %2347 = vrcp.f32 %v2431_v16 }
 0x1f8   : > { %v972_v5 = vpop.f32.mrf.mxu2 }
 0x1f9   : > { %v973_v7 = vadd.f32 %v2743_v59, %v972_v5 }
 0x1fa   : > { %v2344_v9 = vpop.eup %2343 }
 0x1fb   : > { %v1048_v8 = vmul.f32 %v973_v7, %v973_v7  ;;  %2159 = vmatmul.msk.f32.vlgmr.msra.gmra.mxu3 %vm575_vm2, %v2344_v9  ;;  %v2346_v19 = vpop.eup %2345 }
 0x1fc   : > { %2157 = vmatmul.msk.f32.gmra.mxu2 %vm575_vm2, %v2346_v19  ;;  %v2348_v21 = vpop.eup %2347 }
 0x1fd   : > { %v1101_v25 = vsel %vm1070_vm3, %v1048_v8, 0.0  ;;  %v1168_v23 = vmul.f32 8.0, %v2348_v21  ;;  %vm1172_vm4 = vweird.f32 %v2348_v21 }
 0x1fe   : > { %1102 = vadd.xlane.f32.xlu1 %v1101_v25 }
 0x1ff   : > { %v1169_v28 = vsub.f32 1.0, %v1168_v23 }
 0x200   : > { %v975_v10 = vpop.f32.mrf.mxu2 }
 0x201   : > { %v976_v11 = vadd.f32 %v2743_v59, %v975_v10  ;;  %v1170_v30 = vmul.f32 %v2348_v21, %v1169_v28 }
 0x203   : > { %v1049_v14 = vmul.f32 %v976_v11, %v976_v11  ;;  %v1171_v35 = vadd.f32 %v2348_v21, %v1170_v30 }
 0x205   : > { %v1104_v15 = vsel %vm1070_vm3, %v1049_v14, 0.0  ;;  %v2799_v37 = vsel %vm1172_vm4, %v2348_v21, %v1171_v35  ;;  %vm1980_vm4 = vcmask 1040384  }
 0x206   : > { %1105 = vadd.xlane.f32.xlu2 %v1104_v15 }
 0x208   : > { %v978_v17 = vpop.f32.mrf.mxu2 }
 0x209   : > { %v979_v18 = vadd.f32 %v2743_v59, %v978_v17 }
 0x20b   : > { %v1050_v20 = vmul.f32 %v979_v18, %v979_v18 }
 0x20d   : > { %v1107_v22 = vsel %vm1070_vm3, %v1050_v20, 0.0 }
 0x20e   : > { %1108 = vadd.xlane.f32.xlu0 %v1107_v22 }
 0x210   : > { %v981_v24 = vpop.f32.mrf.mxu2 }
 0x211   : > { %v982_v26 = vadd.f32 %v2743_v59, %v981_v24 }
 0x213   : > { %v1051_v27 = vmul.f32 %v982_v26, %v982_v26 }
 0x215   : > { %v1110_v29 = vsel %vm1070_vm3, %v1051_v27, 0.0 }
 0x216   : > { %1111 = vadd.xlane.f32.xlu1 %v1110_v29 }
 0x218   : > { %v984_v32 = vpop.f32.mrf.mxu2 }
 0x219   : > { %v985_v33 = vadd.f32 %v2743_v59, %v984_v32 }
 0x21b   : > { %v1052_v34 = vmul.f32 %v985_v33, %v985_v33 }
 0x21d   : > { %v1113_v36 = vsel %vm1070_vm3, %v1052_v34, 0.0  ;;  %v758_v34 = vpop.f32.mrf.mxu1 }
 0x21e   : > { %1114 = vadd.xlane.f32.xlu2 %v1113_v36  ;;  %v759_v35 = vadd.f32 %v2671_v31, %v758_v34 }
 0x220   : > { %v987_v38 = vpop.f32.mrf.mxu2 }
 0x221   : > { %v988_v39 = vadd.f32 %v2743_v59, %v987_v38  ;;  %v1073_v40 = vpop.xlane.xlu0 %1072  ;;  %v764_v16 = vpop.f32.mrf.mxu3 }
 0x222   : > { %v1174_v41 = vmul.f32 %v2799_v37, %v1073_v40  ;;  %v765_v17 = vadd.f32 %v2671_v31, %v764_v16 }
 0x223   : > { %v1053_v42 = vmul.f32 %v988_v39, %v988_v39 }
 0x224   : > { %v1238_v43 = vperm.slane %v1174_v41, 0  ;;  %v1239_v44 = vperm.slane %v1174_v41, 1  ;;  %v1240_v45 = vperm.slane %v1174_v41, 2  ;;  %v1241_v46 = vperm.slane %v1174_v41, 3 }
 0x225   : > { %v1242_v47 = vperm.slane %v1174_v41, 4  ;;  %v1116_v48 = vsel %vm1070_vm3, %v1053_v42, 0.0  ;;  %v1243_v49 = vperm.slane %v1174_v41, 5  ;;  %v1244_v50 = vperm.slane %v1174_v41, 6 }
 0x226   : > { %1494 = vst [vmem:[#allocation1] ss:$9 sm:$0xff] %v1238_v43  ;;  %1117 = vadd.xlane.f32.xlu0 %v1116_v48  ;;  %v1245_v52 = vperm.slane %v1174_v41, 7  ;;  %2349 = vtanh.f32 %v765_v17 }
 0x227   : > { %1496 = vst [vmem:[#allocation1 + $0x1] ss:$9 sm:$0xff] %v1239_v44 }
 0x228   : > { %1498 = vst [vmem:[#allocation1 + $0x2] ss:$9 sm:$0xff] %v1240_v45  ;;  %v990_v51 = vpop.f32.mrf.mxu2 }
 0x229   : > { %1500 = vst [vmem:[#allocation1 + $0x3] ss:$9 sm:$0xff] %v1241_v46  ;;  %v991_v53 = vadd.f32 %v2743_v59, %v990_v51  ;;  %v1076_v54 = vpop.xlane.xlu0 %1075  ;;  %v767_v32 = vpop.f32.mrf.mxu3 }
 0x22a   : > { %1502 = vst [vmem:[#allocation1 + $0x4] ss:$9 sm:$0xff] %v1242_v47  ;;  %v1175_v57 = vmul.f32 %v2799_v37, %v1076_v54  ;;  %v768_v33 = vadd.f32 %v2671_v31, %v767_v32 }
 0x22b   : > { %1504 = vst [vmem:[#allocation1 + $0x5] ss:$9 sm:$0xff] %v1243_v49  ;;  %v1054_v56 = vmul.f32 %v991_v53, %v991_v53 }
 0x22c   : > { %1506 = vst [vmem:[#allocation1 + $0x6] ss:$9 sm:$0xff] %v1244_v50  ;;  %v1246_v60 = vperm.slane %v1175_v57, 0  ;;  %v1247_v61 = vperm.slane %v1175_v57, 1  ;;  %v1248_v62 = vperm.slane %v1175_v57, 2  ;;  %v1249_v0 = vperm.slane %v1175_v57, 3  ;;  %v2350_v21 = vpop.eup %2349 }
 0x22d   : > { %1508 = vst [vmem:[#allocation1 + $0x7] ss:$9 sm:$0xff] %v1245_v52  ;;  %v1119_v58 = vsel %vm1070_vm3, %v1054_v56, 0.0  ;;  %v1250_v1 = vperm.slane %v1175_v57, 4  ;;  %v1251_v2 = vperm.slane %v1175_v57, 5  ;;  %v1252_v3 = vperm.slane %v1175_v57, 6  ;;  %2160 = vmatmul.msk.f32.gmra.mxu3 %vm575_vm2, %v2350_v21 }
 0x22e   : > { %1120 = vadd.xlane.f32.xlu1 %v1119_v58  ;;  %v1253_v4 = vperm.slane %v1175_v57, 7  ;;  %2351 = vtanh.f32 %v768_v33 }
 0x22f   : > { %2353 = vtanh.f32 %v759_v35 }
 0x230   : > { %v993_v39 = vpop.f32.mrf.mxu2 }
 0x231   : > { %v1079_v5 = vpop.xlane.xlu1 %1078  ;;  %v770_v51 = vpop.f32.mrf.mxu3  ;;  %v994_v56 = vadd.f32 %v2743_v59, %v993_v39 }
 0x232   : > { %v1176_v6 = vmul.f32 %v2799_v37, %v1079_v5  ;;  %v771_v52 = vadd.f32 %v2671_v31, %v770_v51 }
 0x233   : > { %v1055_v31 = vmul.f32 %v994_v56, %v994_v56 }
 0x234   : > { %v1509_v63 = vld [vmem:[#allocation1] sm:$0xff]  ;;  %v1254_v7 = vperm.slane %v1176_v6, 0  ;;  %v1255_v8 = vperm.slane %v1176_v6, 1  ;;  %v1256_v25 = vperm.slane %v1176_v6, 2  ;;  %v1257_v10 = vperm.slane %v1176_v6, 3  ;;  %v2352_v41 = vpop.eup %2351 }
 0x235   : > { %1510 = vst [vmem:[#allocation1] ss:$9 sm:$0xff] %v1246_v60  ;;  %v1258_v11 = vperm.slane %v1176_v6, 4  ;;  %v1259_v12 = vperm.slane %v1176_v6, 5  ;;  %v1260_v13 = vperm.slane %v1176_v6, 6  ;;  %v1261_v14 = vperm.slane %v1176_v6, 7  ;;  %v2354_v43 = vpop.eup %2353  ;;  %2161 = vmatmul.msk.f32.gmra.mxu3 %vm575_vm2, %v2352_v41 }
 0x236   : > { %1511 = vst [vmem:[#allocation1 + $0x1] ss:$9 sm:$0xff] %v1247_v61  ;;  %1790 = vperm.xlu2 %2229, %v1509_v63   ;;  %2158 = vmatmul.msk.f32.gmra.mxu2 %vm575_vm2, %v2354_v43  ;;  %2355 = vtanh.f32 %v771_v52  ;;  %v1122_v5 = vsel %vm1070_vm3, %v1055_v31, 0.0 }
 0x237   : > { %1512 = vst [vmem:[#allocation1 + $0x2] ss:$9 sm:$0xff] %v1248_v62 }
 0x238   : > { %1513 = vst [vmem:[#allocation1 + $0x3] ss:$9 sm:$0xff] %v1249_v0  ;;  %v996_v53 = vpop.f32.mrf.mxu2 }
 0x239   : > { %1514 = vst [vmem:[#allocation1 + $0x4] ss:$9 sm:$0xff] %v1250_v1  ;;  %v1082_v15 = vpop.xlane.xlu1 %1081 }
 0x23a   : > { %1515 = vst [vmem:[#allocation1 + $0x5] ss:$9 sm:$0xff] %v1251_v2  ;;  %v1177_v18 = vmul.f32 %v2799_v37, %v1082_v15 }
 0x23b   : > { %1516 = vst [vmem:[#allocation1 + $0x6] ss:$9 sm:$0xff] %v1252_v3 }
 0x23c   : > { %1517 = vst [vmem:[#allocation1 + $0x7] ss:$9 sm:$0xff] %v1253_v4  ;;  %v1262_v19 = vperm.slane %v1177_v18, 0  ;;  %v1263_v20 = vperm.slane %v1177_v18, 1  ;;  %v1264_v22 = vperm.slane %v1177_v18, 2  ;;  %v1265_v24 = vperm.slane %v1177_v18, 3  ;;  %v2356_v58 = vpop.eup %2355 }
 0x23d   : > { %v1266_v26 = vperm.slane %v1177_v18, 4  ;;  %v1267_v27 = vperm.slane %v1177_v18, 5  ;;  %v1268_v28 = vperm.slane %v1177_v18, 6  ;;  %v1269_v29 = vperm.slane %v1177_v18, 7  ;;  %2162 = vmatmul.msk.f32.gmra.mxu3 %vm575_vm2, %v2356_v58 }
 0x240   : > { %v999_v1 = vpop.f32.mrf.mxu2 }
 0x241   : > { %v1085_v30 = vpop.xlane.xlu2 %1084 }
 0x242   : > { %v1178_v36 = vmul.f32 %v2799_v37, %v1085_v30 }
 0x243   : > { %v1518_v9 = vld [vmem:[#allocation1] sm:$0xff] }
 0x244   : > { %1519 = vst [vmem:[#allocation1] ss:$9 sm:$0xff] %v1254_v7  ;;  %1793 = vperm.xlu0 %2230, %v1518_v9   ;;  %v1270_v38 = vperm.slane %v1178_v36, 0  ;;  %v1271_v40 = vperm.slane %v1178_v36, 1  ;;  %v1272_v42 = vperm.slane %v1178_v36, 2  ;;  %v1273_v45 = vperm.slane %v1178_v36, 3 }
 0x245   : > { %1520 = vst [vmem:[#allocation1 + $0x1] ss:$9 sm:$0xff] %v1255_v8  ;;  %v1274_v46 = vperm.slane %v1178_v36, 4  ;;  %v1275_v47 = vperm.slane %v1178_v36, 5  ;;  %v1276_v48 = vperm.slane %v1178_v36, 6  ;;  %v1277_v49 = vperm.slane %v1178_v36, 7 }
 0x246   : > { %1521 = vst [vmem:[#allocation1 + $0x2] ss:$9 sm:$0xff] %v1256_v25  ;;  %v997_v7 = vadd.f32 %v2743_v59, %v996_v53 }
 0x247   : > { %1522 = vst [vmem:[#allocation1 + $0x3] ss:$9 sm:$0xff] %v1257_v10 }
 0x248   : > { %1523 = vst [vmem:[#allocation1 + $0x4] ss:$9 sm:$0xff] %v1258_v11  ;;  %v2827_v25 = vpop.f32.mrf.mxu2  ;;  %v1056_v10 = vmul.f32 %v997_v7, %v997_v7 }
 0x249   : > { %1524 = vst [vmem:[#allocation1 + $0x5] ss:$9 sm:$0xff] %v1259_v12  ;;  %v1088_v50 = vpop.xlane.xlu2 %1087 }
 0x24a   : > { %1525 = vst [vmem:[#allocation1 + $0x6] ss:$9 sm:$0xff] %v1260_v13  ;;  %v1179_v54 = vmul.f32 %v2799_v37, %v1088_v50  ;;  %v1125_v17 = vsel %vm1070_vm3, %v1056_v10, 0.0 }
 0x24b   : > { %1526 = vst [vmem:[#allocation1 + $0x7] ss:$9 sm:$0xff] %v1261_v14 }
 0x24c   : > { %v1278_v55 = vperm.slane %v1179_v54, 0  ;;  %v1279_v57 = vperm.slane %v1179_v54, 1  ;;  %v1280_v60 = vperm.slane %v1179_v54, 2  ;;  %v1281_v62 = vperm.slane %v1179_v54, 3 }
 0x24d   : > { %v1282_v63 = vperm.slane %v1179_v54, 4  ;;  %v1283_v0 = vperm.slane %v1179_v54, 5  ;;  %v1284_v2 = vperm.slane %v1179_v54, 6  ;;  %v1285_v3 = vperm.slane %v1179_v54, 7 }
 0x251   : > { %v1091_v4 = vpop.xlane.xlu0 %1090 }
 0x252   : > { %v1527_v23 = vld [vmem:[#allocation1] sm:$0xff]  ;;  %v1180_v6 = vmul.f32 %v2799_v37, %v1091_v4 }
 0x253   : > { %1528 = vst [vmem:[#allocation1] ss:$9 sm:$0xff] %v1262_v19  ;;  %1796 = vperm.xlu1 %2231, %v1527_v23  }
 0x254   : > { %1529 = vst [vmem:[#allocation1 + $0x1] ss:$9 sm:$0xff] %v1263_v20  ;;  %v1286_v8 = vperm.slane %v1180_v6, 0  ;;  %v1287_v9 = vperm.slane %v1180_v6, 1  ;;  %v1288_v11 = vperm.slane %v1180_v6, 2  ;;  %v1289_v13 = vperm.slane %v1180_v6, 3  ;;  %v1005_v20 = vpop.f32.mrf.mxu2 }
 0x255   : > { %1530 = vst [vmem:[#allocation1 + $0x2] ss:$9 sm:$0xff] %v1264_v22  ;;  %v1290_v14 = vperm.slane %v1180_v6, 4  ;;  %v1291_v15 = vperm.slane %v1180_v6, 5  ;;  %v1292_v16 = vperm.slane %v1180_v6, 6  ;;  %v1293_v18 = vperm.slane %v1180_v6, 7 }
 0x256   : > { %1531 = vst [vmem:[#allocation1 + $0x3] ss:$9 sm:$0xff] %v1265_v24  ;;  %v1006_v22 = vadd.f32 %v2743_v59, %v1005_v20 }
 0x257   : > { %1532 = vst [vmem:[#allocation1 + $0x4] ss:$9 sm:$0xff] %v1266_v26 }
 0x258   : > { %1533 = vst [vmem:[#allocation1 + $0x5] ss:$9 sm:$0xff] %v1267_v27  ;;  %v1059_v27 = vmul.f32 %v1006_v22, %v1006_v22 }
 0x259   : > { %1534 = vst [vmem:[#allocation1 + $0x6] ss:$9 sm:$0xff] %v1268_v28  ;;  %v1094_v19 = vpop.xlane.xlu1 %1093 }
 0x25a   : > { %1535 = vst [vmem:[#allocation1 + $0x7] ss:$9 sm:$0xff] %v1269_v29  ;;  %v1181_v21 = vmul.f32 %v2799_v37, %v1094_v19  ;;  %v1134_v34 = vsel %vm1070_vm3, %v1059_v27, 0.0 }
 0x25c   : > { %v1294_v23 = vperm.slane %v1181_v21, 0  ;;  %v1295_v24 = vperm.slane %v1181_v21, 1  ;;  %v1296_v26 = vperm.slane %v1181_v21, 2  ;;  %v1297_v29 = vperm.slane %v1181_v21, 3 }
 0x25d   : > { %v1298_v30 = vperm.slane %v1181_v21, 4  ;;  %v1299_v32 = vperm.slane %v1181_v21, 5  ;;  %v1300_v33 = vperm.slane %v1181_v21, 6  ;;  %v1301_v35 = vperm.slane %v1181_v21, 7 }
 0x25f   : > { %1123 = vadd.xlane.f32.xlu2 %v1122_v5 }
 0x261   : > { %v2814_v44 = vld [vmem:[#allocation1] sm:$0xff]  ;;  %v1097_v36 = vpop.xlane.xlu2 %1096 }
 0x262   : > { %1537 = vst [vmem:[#allocation1] ss:$9 sm:$0xff] %v1270_v38  ;;  %v1000_v38 = vadd.f32 %v2743_v59, %v999_v1  ;;  %v1182_v39 = vmul.f32 %v2799_v37, %v1097_v36 }
 0x263   : > { %1538 = vst [vmem:[#allocation1 + $0x1] ss:$9 sm:$0xff] %v1271_v40 }
 0x264   : > { %1539 = vst [vmem:[#allocation1 + $0x2] ss:$9 sm:$0xff] %v1272_v42  ;;  %v1057_v40 = vmul.f32 %v1000_v38, %v1000_v38  ;;  %v1302_v41 = vperm.slane %v1182_v39, 0  ;;  %v1303_v42 = vperm.slane %v1182_v39, 1  ;;  %v1304_v43 = vperm.slane %v1182_v39, 2 }
 0x265   : > { %1540 = vst [vmem:[#allocation1 + $0x3] ss:$9 sm:$0xff] %v1273_v45  ;;  %v1305_v45 = vperm.slane %v1182_v39, 3  ;;  %v1309_v50 = vperm.slane %v1182_v39, 7 }
 0x266   : > { %1541 = vst [vmem:[#allocation1 + $0x4] ss:$9 sm:$0xff] %v1274_v46  ;;  %v1128_v46 = vsel %vm1070_vm3, %v1057_v40, 0.0 }
 0x267   : > { %1542 = vst [vmem:[#allocation1 + $0x5] ss:$9 sm:$0xff] %v1275_v47  ;;  %v1306_v47 = vperm.slane %v1182_v39, 4 }
 0x268   : > { %1543 = vst [vmem:[#allocation1 + $0x6] ss:$9 sm:$0xff] %v1276_v48  ;;  %v1307_v48 = vperm.slane %v1182_v39, 5 }
 0x269   : > { %1544 = vst [vmem:[#allocation1 + $0x7] ss:$9 sm:$0xff] %v1277_v49  ;;  %v1308_v49 = vperm.slane %v1182_v39, 6  ;;  %v1100_v51 = vpop.xlane.xlu0 %1099 }
 0x26a   : > { %v1183_v52 = vmul.f32 %v2799_v37, %v1100_v51  ;;  %v1003_v51 = vadd.f32 %v2743_v59, %v2827_v25 }
 0x26c   : > { %v1310_v53 = vperm.slane %v1183_v52, 0  ;;  %v1311_v54 = vperm.slane %v1183_v52, 1  ;;  %v1314_v58 = vperm.slane %v1183_v52, 4 }
 0x26e   : > { %1126 = vadd.xlane.f32.xlu0 %v1125_v17 }
 0x270   : > { %v2821_v61 = vld [vmem:[#allocation1] sm:$0xff] }
 0x271   : > { %1546 = vst [vmem:[#allocation1] ss:$9 sm:$0xff] %v1278_v55  ;;  %v1312_v55 = vperm.slane %v1183_v52, 2  ;;  %v1103_v31 = vpop.xlane.xlu1 %1102 }
 0x272   : > { %1547 = vst [vmem:[#allocation1 + $0x1] ss:$9 sm:$0xff] %v1279_v57  ;;  %v1313_v57 = vperm.slane %v1183_v52, 3 }
 0x273   : > { %1548 = vst [vmem:[#allocation1 + $0x2] ss:$9 sm:$0xff] %v1280_v60  ;;  %v1315_v60 = vperm.slane %v1183_v52, 5 }
 0x274   : > { %1549 = vst [vmem:[#allocation1 + $0x3] ss:$9 sm:$0xff] %v1281_v62  ;;  %v1316_v62 = vperm.slane %v1183_v52, 6 }
 0x275   : > { %1550 = vst [vmem:[#allocation1 + $0x4] ss:$9 sm:$0xff] %v1282_v63  ;;  %v1317_v63 = vperm.slane %v1183_v52, 7 }
 0x276   : > { %1551 = vst [vmem:[#allocation1 + $0x5] ss:$9 sm:$0xff] %v1283_v0  ;;  %1135 = vadd.xlane.f32.xlu0 %v1134_v34  ;;  %v1184_v0 = vmul.f32 %v2799_v37, %v1103_v31 }
 0x277   : > { %1552 = vst [vmem:[#allocation1 + $0x6] ss:$9 sm:$0xff] %v1284_v2  ;;  %1799 = vperm.xlu2 %2229, %v2814_v44  }
 0x278   : > { %1553 = vst [vmem:[#allocation1 + $0x7] ss:$9 sm:$0xff] %v1285_v3  ;;  %v1318_v1 = vperm.slane %v1184_v0, 0  ;;  %v1319_v2 = vperm.slane %v1184_v0, 1  ;;  %v1320_v3 = vperm.slane %v1184_v0, 2  ;;  %v1321_v5 = vperm.slane %v1184_v0, 3 }
 0x279   : > { %v1322_v6 = vperm.slane %v1184_v0, 4  ;;  %v1323_v7 = vperm.slane %v1184_v0, 5  ;;  %v1325_v10 = vperm.slane %v1184_v0, 7 }
 0x27d   : > { %1129 = vadd.xlane.f32.xlu1 %v1128_v46 }
 0x27f   : > { %v2829_v12 = vld [vmem:[#allocation1] sm:$0xff] }
 0x280   : > { %1555 = vst [vmem:[#allocation1] ss:$9 sm:$0xff] %v1286_v8  ;;  %v1324_v8 = vperm.slane %v1184_v0, 6 }
 0x281   : > { %1556 = vst [vmem:[#allocation1 + $0x1] ss:$9 sm:$0xff] %v1287_v9  ;;  %v773_v9 = vpop.f32.mrf.mxu3 }
 0x282   : > { %1557 = vst [vmem:[#allocation1 + $0x2] ss:$9 sm:$0xff] %v1288_v11  ;;  %v2851_v11 = vld [vmem:[%s3113_s4] ss:$0 sm:$0xff] }
 0x283   : > { %1558 = vst [vmem:[#allocation1 + $0x3] ss:$9 sm:$0xff] %v1289_v13  ;;  %v1106_v13 = vpop.xlane.xlu2 %1105 }
 0x284   : > { %1559 = vst [vmem:[#allocation1 + $0x4] ss:$9 sm:$0xff] %v1290_v14  ;;  %v1185_v14 = vmul.f32 %v2799_v37, %v1106_v13 }
 0x285   : > { %1560 = vst [vmem:[#allocation1 + $0x5] ss:$9 sm:$0xff] %v1291_v15 }
 0x286   : > { %1561 = vst [vmem:[#allocation1 + $0x6] ss:$9 sm:$0xff] %v1292_v16  ;;  %v1326_v16 = vperm.slane %v1185_v14, 0  ;;  %v1327_v17 = vperm.slane %v1185_v14, 1  ;;  %v1329_v20 = vperm.slane %v1185_v14, 3  ;;  %v1330_v21 = vperm.slane %v1185_v14, 4 }
 0x287   : > { %1562 = vst [vmem:[#allocation1 + $0x7] ss:$9 sm:$0xff] %v1293_v18  ;;  %v1328_v18 = vperm.slane %v1185_v14, 2  ;;  %v1331_v22 = vperm.slane %v1185_v14, 5 }
 0x289   : > { %v1112_v46 = vpop.xlane.xlu1 %1111 }
 0x28e   : > { %v2834_v28 = vld [vmem:[#allocation1] sm:$0xff] }
 0x28f   : > { %1564 = vst [vmem:[#allocation1] ss:$9 sm:$0xff] %v1294_v23  ;;  %v1332_v23 = vperm.slane %v1185_v14, 6 }
 0x290   : > { %1565 = vst [vmem:[#allocation1 + $0x1] ss:$9 sm:$0xff] %v1295_v24  ;;  %v776_v24 = vpop.f32.mrf.mxu3 }
 0x291   : > { %1566 = vst [vmem:[#allocation1 + $0x2] ss:$9 sm:$0xff] %v1296_v26  ;;  %v1333_v26 = vperm.slane %v1185_v14, 7  ;;  %v777_v27 = vadd.f32 %v2851_v11, %v776_v24 }
 0x292   : > { %1567 = vst [vmem:[#allocation1 + $0x3] ss:$9 sm:$0xff] %v1297_v29  ;;  %v1109_v29 = vpop.xlane.xlu0 %1108 }
 0x293   : > { %1568 = vst [vmem:[#allocation1 + $0x4] ss:$9 sm:$0xff] %v1298_v30  ;;  %v1186_v30 = vmul.f32 %v2799_v37, %v1109_v29 }
 0x294   : > { %1569 = vst [vmem:[#allocation1 + $0x5] ss:$9 sm:$0xff] %v1299_v32 }
 0x295   : > { %1570 = vst [vmem:[#allocation1 + $0x6] ss:$9 sm:$0xff] %v1300_v33  ;;  %v1334_v33 = vperm.slane %v1186_v30, 0  ;;  %v1335_v34 = vperm.slane %v1186_v30, 1  ;;  %v1337_v38 = vperm.slane %v1186_v30, 3  ;;  %v1338_v39 = vperm.slane %v1186_v30, 4 }
 0x296   : > { %1571 = vst [vmem:[#allocation1 + $0x7] ss:$9 sm:$0xff] %v1301_v35  ;;  %1805 = vperm.xlu1 %2231, %v2829_v12   ;;  %v774_v12 = vadd.f32 %v2851_v11, %v773_v9  ;;  %v1336_v35 = vperm.slane %v1186_v30, 2  ;;  %v1339_v40 = vperm.slane %v1186_v30, 5 }
 0x298   : > { %2357 = vtanh.f32 %v774_v12 }
 0x299   : > { %2359 = vtanh.f32 %v777_v27 }
 0x29a   : > { %v1118_v12 = vpop.xlane.xlu0 %1117 }
 0x29d   : > { %v2840_v44 = vld [vmem:[#allocation1] sm:$0xff] }
 0x29e   : > { %1573 = vst [vmem:[#allocation1] ss:$9 sm:$0xff] %v1302_v41  ;;  %v2358_v15 = vpop.eup %2357  ;;  %v1340_v41 = vperm.slane %v1186_v30, 6 }
 0x29f   : > { %1574 = vst [vmem:[#allocation1 + $0x1] ss:$9 sm:$0xff] %v1303_v42  ;;  %2163 = vmatmul.msk.f32.gmra.mxu3 %vm575_vm2, %v2358_v15  ;;  %v2360_v32 = vpop.eup %2359  ;;  %v779_v42 = vpop.f32.mrf.mxu3 }
 0x2a0   : > { %1575 = vst [vmem:[#allocation1 + $0x2] ss:$9 sm:$0xff] %v1304_v43  ;;  %v1341_v43 = vperm.slane %v1186_v30, 7 }
 0x2a1   : > { %1576 = vst [vmem:[#allocation1 + $0x3] ss:$9 sm:$0xff] %v1305_v45  ;;  %v780_v45 = vadd.f32 %v2851_v11, %v779_v42  ;;  %v1121_v14 = vpop.xlane.xlu1 %1120 }
 0x2a2   : > { %1577 = vst [vmem:[#allocation1 + $0x4] ss:$9 sm:$0xff] %v1306_v47  ;;  %v1187_v47 = vmul.f32 %v2799_v37, %v1112_v46 }
 0x2a3   : > { %1578 = vst [vmem:[#allocation1 + $0x5] ss:$9 sm:$0xff] %v1307_v48  ;;  %2361 = vtanh.f32 %v780_v45 }
 0x2a4   : > { %1579 = vst [vmem:[#allocation1 + $0x6] ss:$9 sm:$0xff] %v1308_v49  ;;  %v1342_v49 = vperm.slane %v1187_v47, 0  ;;  %v1344_v52 = vperm.slane %v1187_v47, 2 }
 0x2a5   : > { %1580 = vst [vmem:[#allocation1 + $0x7] ss:$9 sm:$0xff] %v1309_v50  ;;  %v1343_v50 = vperm.slane %v1187_v47, 1 }
 0x2a7   : > { %2164 = vmatmul.msk.f32.gmra.mxu3 %vm575_vm2, %v2360_v32  ;;  %v782_v25 = vpop.f32.mrf.mxu3  ;;  %v1008_v32 = vpop.f32.mrf.mxu2 }
 0x2a9   : > { %v2362_v48 = vpop.eup %2361 }
 0x2ac   : > { %v1581_v56 = vld [vmem:[#allocation1] sm:$0xff] }
 0x2ad   : > { %1582 = vst [vmem:[#allocation1] ss:$9 sm:$0xff] %v1310_v53  ;;  %1814 = vperm.xlu0 %2230, %v1581_v56   ;;  %v1347_v56 = vperm.slane %v1187_v47, 5 }
 0x2ae   : > { %1583 = vst [vmem:[#allocation1 + $0x1] ss:$9 sm:$0xff] %v1311_v54  ;;  %v1345_v54 = vperm.slane %v1187_v47, 3 }
 0x2af   : > { %1584 = vst [vmem:[#allocation1 + $0x2] ss:$9 sm:$0xff] %v1312_v55  ;;  %2165 = vmatmul.msk.f32.gmra.mxu3 %vm575_vm2, %v2362_v48  ;;  %v1346_v55 = vperm.slane %v1187_v47, 4  ;;  %v1014_v13 = vpop.f32.mrf.mxu3 }
 0x2b0   : > { %1585 = vst [vmem:[#allocation1 + $0x3] ss:$9 sm:$0xff] %v1313_v57  ;;  %v1058_v57 = vmul.f32 %v1003_v51, %v1003_v51  ;;  %v1190_v51 = vmul.f32 %v2799_v37, %v1121_v14 }
 0x2b1   : > { %1586 = vst [vmem:[#allocation1 + $0x4] ss:$9 sm:$0xff] %v1314_v58  ;;  %v1348_v58 = vperm.slane %v1187_v47, 6 }
 0x2b2   : > { %1587 = vst [vmem:[#allocation1 + $0x5] ss:$9 sm:$0xff] %v1315_v60  ;;  %v1349_v60 = vperm.slane %v1187_v47, 7 }
 0x2b3   : > { %1588 = vst [vmem:[#allocation1 + $0x6] ss:$9 sm:$0xff] %v1316_v62  ;;  %v1115_v62 = vpop.xlane.xlu2 %1114 }
 0x2b4   : > { %1589 = vst [vmem:[#allocation1 + $0x7] ss:$9 sm:$0xff] %v1317_v63  ;;  %v1131_v63 = vsel %vm1070_vm3, %v1058_v57, 0.0  ;;  %v1188_v59 = vmul.f32 %v2799_v37, %v1115_v62  ;;  %v1370_v57 = vperm.slane %v1190_v51, 4  ;;  %v1373_v62 = vperm.slane %v1190_v51, 7 }
 0x2b5   : > { %1132 = vadd.xlane.f32.xlu2 %v1131_v63 }
 0x2b6   : > { %v1350_v31 = vperm.slane %v1188_v59, 0  ;;  %v1351_v0 = vperm.slane %v1188_v59, 1  ;;  %v1357_v9 = vperm.slane %v1188_v59, 7  ;;  %v1794_v27 = vpop.permute.xlu0 %1793 }
 0x2b7   : > { %v1017_v63 = vpop.f32.mrf.mxu3 }
 0x2bb   : > { %v2846_v4 = vld [vmem:[#allocation1] sm:$0xff] }
 0x2bc   : > { %1591 = vst [vmem:[#allocation1] ss:$9 sm:$0xff] %v1318_v1  ;;  %v783_v1 = vadd.f32 %v2851_v11, %v782_v25  ;;  %v2878_v11 = vld [vmem:[%s3115_s6] ss:$0 sm:$0xff] }
 0x2bd   : > { %1592 = vst [vmem:[#allocation1 + $0x1] ss:$9 sm:$0xff] %v1319_v2  ;;  %v1352_v2 = vperm.slane %v1188_v59, 2  ;;  %v1015_v15 = vadd.f32 %v2878_v11, %v1014_v13 }
 0x2be   : > { %1593 = vst [vmem:[#allocation1 + $0x2] ss:$9 sm:$0xff] %v1320_v3  ;;  %2363 = vtanh.f32 %v783_v1 }
 0x2bf   : > { %1594 = vst [vmem:[#allocation1 + $0x3] ss:$9 sm:$0xff] %v1321_v5  ;;  %v1353_v5 = vperm.slane %v1188_v59, 3 }
 0x2c0   : > { %1595 = vst [vmem:[#allocation1 + $0x4] ss:$9 sm:$0xff] %v1322_v6  ;;  %v1354_v6 = vperm.slane %v1188_v59, 4 }
 0x2c1   : > { %1596 = vst [vmem:[#allocation1 + $0x5] ss:$9 sm:$0xff] %v1323_v7  ;;  %v1355_v7 = vperm.slane %v1188_v59, 5 }
 0x2c2   : > { %1597 = vst [vmem:[#allocation1 + $0x6] ss:$9 sm:$0xff] %v1324_v8  ;;  %v1356_v8 = vperm.slane %v1188_v59, 6 }
 0x2c3   : > { %1598 = vst [vmem:[#allocation1 + $0x7] ss:$9 sm:$0xff] %v1325_v10  ;;  %v1885_v10 = vlaneseq }
 0x2ca   : > { %v2856_v19 = vld [vmem:[#allocation1] sm:$0xff] }
 0x2cb   : > { %1600 = vst [vmem:[#allocation1] ss:$9 sm:$0xff] %v1326_v16  ;;  %v2364_v16 = vpop.eup %2363 }
 0x2cc   : > { %1601 = vst [vmem:[#allocation1 + $0x1] ss:$9 sm:$0xff] %v1327_v17  ;;  %v1062_v17 = vmul.f32 %v1015_v15, %v1015_v15  ;;  %2166 = vmatmul.msk.f32.gmra.mxu3 %vm575_vm2, %v2364_v16  ;;  %vm1942_vm2 = vcmask 982912  }
 0x2cd   : > { %1602 = vst [vmem:[#allocation1 + $0x2] ss:$9 sm:$0xff] %v1328_v18  ;;  %v2883_v18 = vand.u32 127, %v1885_v10  ;;  %1802 = vperm.xlu2 %2229, %v2821_v61   ;;  %v1367_v61 = vperm.slane %v1190_v51, 1 }
 0x2ce   : > { %1603 = vst [vmem:[#allocation1 + $0x3] ss:$9 sm:$0xff] %v1329_v20  ;;  %v1189_v20 = vmul.f32 %v2799_v37, %v1118_v12  ;;  %v1011_v12 = vpop.f32.mrf.mxu2 }
 0x2cf   : > { %1604 = vst [vmem:[#allocation1 + $0x4] ss:$9 sm:$0xff] %v1330_v21  ;;  %v1791_v21 = vpop.permute.xlu2 %1790  ;;  %v1012_v13 = vadd.f32 %v2878_v11, %v1011_v12 }
 0x2d0   : > { %1605 = vst [vmem:[#allocation1 + $0x5] ss:$9 sm:$0xff] %v1331_v22  ;;  %v1143_v22 = vsel %vm1070_vm3, %v1062_v17, 0.0  ;;  %v1887_v24 = vperm.slane %v1791_v21, %v2883_v18  ;;  %v1359_v29 = vperm.slane %v1189_v20, 1  ;;  %v1363_v46 = vperm.slane %v1189_v20, 5 }
 0x2d1   : > { %1606 = vst [vmem:[#allocation1 + $0x6] ss:$9 sm:$0xff] %v1332_v23  ;;  %v2888_v23 = vadd.s32 4294967288, %v2883_v18  ;;  %v1364_v48 = vperm.slane %v1189_v20, 6 }
 0x2d2   : > { %1607 = vst [vmem:[#allocation1 + $0x7] ss:$9 sm:$0xff] %v1333_v26  ;;  %v1358_v26 = vperm.slane %v1189_v20, 0 }
 0x2d3   : > { %v1889_v30 = vperm.slane %v1794_v27, %v2888_v23 }
 0x2d5   : > { %1808 = vperm.xlu2 %2229, %v2834_v28  }
 0x2d7   : > { %1144 = vadd.xlane.f32.xlu0 %v1143_v22  ;;  %v1124_v28 = vpop.xlane.xlu2 %1123  ;;  %v1061_v22 = vmul.f32 %v1012_v13, %v1012_v13 }
 0x2d8   : > { %v1191_v59 = vmul.f32 %v2799_v37, %v1124_v28 }
 0x2d9   : > { %v2861_v36 = vld [vmem:[#allocation1] sm:$0xff] }
 0x2da   : > { %1609 = vst [vmem:[#allocation1] ss:$9 sm:$0xff] %v1334_v33  ;;  %v2893_v33 = vadd.s32 4294967280, %v2883_v18  ;;  %v1374_v25 = vperm.slane %v1191_v59, 0  ;;  %v1377_v1 = vperm.slane %v1191_v59, 3 }
 0x2db   : > { %1610 = vst [vmem:[#allocation1 + $0x1] ss:$9 sm:$0xff] %v1335_v34  ;;  %v1797_v34 = vpop.permute.xlu1 %1796 }
 0x2dc   : > { %1611 = vst [vmem:[#allocation1 + $0x2] ss:$9 sm:$0xff] %v1336_v35  ;;  %v1360_v35 = vperm.slane %v1189_v20, 2  ;;  %v1893_v42 = vperm.slane %v1797_v34, %v2893_v33 }
 0x2dd   : > { %1612 = vst [vmem:[#allocation1 + $0x3] ss:$9 sm:$0xff] %v1337_v38  ;;  %v1009_v38 = vadd.f32 %v2878_v11, %v1008_v32 }
 0x2de   : > { %1613 = vst [vmem:[#allocation1 + $0x4] ss:$9 sm:$0xff] %v1338_v39 }
 0x2df   : > { %1614 = vst [vmem:[#allocation1 + $0x5] ss:$9 sm:$0xff] %v1339_v40  ;;  %v1361_v40 = vperm.slane %v1189_v20, 3  ;;  %v1060_v45 = vmul.f32 %v1009_v38, %v1009_v38 }
 0x2e0   : > { %1615 = vst [vmem:[#allocation1 + $0x6] ss:$9 sm:$0xff] %v1340_v41  ;;  %v1891_v41 = vsel %vm1890_vm5, %v1889_v30, %v1887_v24 }
 0x2e1   : > { %1616 = vst [vmem:[#allocation1 + $0x7] ss:$9 sm:$0xff] %v1341_v43  ;;  %v1362_v43 = vperm.slane %v1189_v20, 4  ;;  %v2902_v47 = vsel %vm1894_vm6, %v1893_v42, %v1891_v41 }
 0x2e8   : > { %v2868_v53 = vld [vmem:[#allocation1] sm:$0xff] }
 0x2e9   : > { %1618 = vst [vmem:[#allocation1] ss:$9 sm:$0xff] %v1342_v49  ;;  %v1137_v49 = vsel %vm1070_vm3, %v1060_v45, 0.0  ;;  %v1018_v45 = vadd.f32 %v2878_v11, %v1017_v63 }
 0x2ea   : > { %1619 = vst [vmem:[#allocation1 + $0x1] ss:$9 sm:$0xff] %v1343_v50  ;;  %v1365_v50 = vperm.slane %v1189_v20, 7  ;;  %1138 = vadd.xlane.f32.xlu1 %v1137_v49 }
 0x2eb   : > { %1620 = vst [vmem:[#allocation1 + $0x2] ss:$9 sm:$0xff] %v1344_v52  ;;  %v1366_v52 = vperm.slane %v1190_v51, 0  ;;  %1823 = vperm.xlu0 %2230, %v2861_v36   ;;  %v1376_v36 = vperm.slane %v1191_v59, 2 }
 0x2ec   : > { %1621 = vst [vmem:[#allocation1 + $0x3] ss:$9 sm:$0xff] %v1345_v54  ;;  %v1368_v54 = vperm.slane %v1190_v51, 2 }
 0x2ed   : > { %1622 = vst [vmem:[#allocation1 + $0x4] ss:$9 sm:$0xff] %v1346_v55 }
 0x2ee   : > { %1623 = vst [vmem:[#allocation1 + $0x5] ss:$9 sm:$0xff] %v1347_v56  ;;  %v1369_v56 = vperm.slane %v1190_v51, 3 }
 0x2ef   : > { %1624 = vst [vmem:[#allocation1 + $0x6] ss:$9 sm:$0xff] %v1348_v58  ;;  %v1371_v58 = vperm.slane %v1190_v51, 5 }
 0x2f0   : > { %1625 = vst [vmem:[#allocation1 + $0x7] ss:$9 sm:$0xff] %v1349_v60  ;;  %v1372_v60 = vperm.slane %v1190_v51, 6  ;;  %v1130_v34 = vpop.xlane.xlu1 %1129 }
 0x2f1   : > { %v1193_v38 = vmul.f32 %v2799_v37, %v1130_v34 }
 0x2f3   : > { %v1390_v41 = vperm.slane %v1193_v38, 0  ;;  %v1391_v42 = vperm.slane %v1193_v38, 1  ;;  %v1394_v49 = vperm.slane %v1193_v38, 4  ;;  %v1396_v51 = vperm.slane %v1193_v38, 6 }
 0x2f7   : > { %v2873_v3 = vld [vmem:[#allocation1] sm:$0xff] }
 0x2f8   : > { %1627 = vst [vmem:[#allocation1] ss:$9 sm:$0xff] %v1350_v31  ;;  %v1375_v31 = vperm.slane %v1191_v59, 1 }
 0x2f9   : > { %1628 = vst [vmem:[#allocation1 + $0x1] ss:$9 sm:$0xff] %v1351_v0 }
 0x2fa   : > { %1629 = vst [vmem:[#allocation1 + $0x2] ss:$9 sm:$0xff] %v1352_v2  ;;  %v1378_v2 = vperm.slane %v1191_v59, 4 }
 0x2fb   : > { %1630 = vst [vmem:[#allocation1 + $0x3] ss:$9 sm:$0xff] %v1353_v5  ;;  %v1379_v5 = vperm.slane %v1191_v59, 5 }
 0x2fc   : > { %1631 = vst [vmem:[#allocation1 + $0x4] ss:$9 sm:$0xff] %v1354_v6  ;;  %v1380_v6 = vperm.slane %v1191_v59, 6 }
 0x2fd   : > { %1632 = vst [vmem:[#allocation1 + $0x5] ss:$9 sm:$0xff] %v1355_v7  ;;  %v2914_v7 = vpop.f32.mrf.mxu3 }
 0x2fe   : > { %1633 = vst [vmem:[#allocation1 + $0x6] ss:$9 sm:$0xff] %v1356_v8  ;;  %v1381_v8 = vperm.slane %v1191_v59, 7  ;;  %v1021_v13 = vadd.f32 %v2878_v11, %v2914_v7 }
 0x2ff   : > { %1634 = vst [vmem:[#allocation1 + $0x7] ss:$9 sm:$0xff] %v1357_v9  ;;  %v1127_v9 = vpop.xlane.xlu0 %1126 }
 0x303   : > { %1811 = vperm.xlu1 %2231, %v2840_v44   ;;  %v1192_v44 = vmul.f32 %v2799_v37, %v1127_v9 }
 0x305   : > { %v1382_v14 = vperm.slane %v1192_v44, 0  ;;  %v1383_v15 = vperm.slane %v1192_v44, 1  ;;  %v1023_v16 = vpop.f32.mrf.mxu3  ;;  %v1384_v17 = vperm.slane %v1192_v44, 2  ;;  %v1385_v21 = vperm.slane %v1192_v44, 3 }
 0x306   : > { %v2896_v39 = vld [vmem:[#allocation1] sm:$0xff]  ;;  %v1386_v24 = vperm.slane %v1192_v44, 4  ;;  %v1387_v27 = vperm.slane %v1192_v44, 5  ;;  %v1389_v30 = vperm.slane %v1192_v44, 7 }
 0x307   : > { %1636 = vst [vmem:[#allocation1] ss:$9 sm:$0xff] %v1358_v26  ;;  %v1024_v26 = vadd.f32 %v2878_v11, %v1023_v16 }
 0x308   : > { %1637 = vst [vmem:[#allocation1 + $0x1] ss:$9 sm:$0xff] %v1359_v29  ;;  %v1388_v29 = vperm.slane %v1192_v44, 6  ;;  %v1136_v44 = vpop.xlane.xlu0 %1135 }
 0x309   : > { %1638 = vst [vmem:[#allocation1 + $0x2] ss:$9 sm:$0xff] %v1360_v35  ;;  %v1065_v32 = vmul.f32 %v1024_v26, %v1024_v26  ;;  %v1140_v35 = vsel %vm1070_vm3, %v1061_v22, 0.0  ;;  %v1064_v22 = vmul.f32 %v1021_v13, %v1021_v13 }
 0x30a   : > { %1639 = vst [vmem:[#allocation1 + $0x3] ss:$9 sm:$0xff] %v1361_v40  ;;  %1141 = vadd.xlane.f32.xlu2 %v1140_v35 }
 0x30b   : > { %1640 = vst [vmem:[#allocation1 + $0x4] ss:$9 sm:$0xff] %v1362_v43  ;;  %v1152_v40 = vsel %vm1070_vm3, %v1065_v32, 0.0  ;;  %v1392_v43 = vperm.slane %v1193_v38, 2 }
 0x30c   : > { %1641 = vst [vmem:[#allocation1 + $0x5] ss:$9 sm:$0xff] %v1363_v46 }
 0x30d   : > { %1642 = vst [vmem:[#allocation1 + $0x6] ss:$9 sm:$0xff] %v1364_v48  ;;  %v1393_v48 = vperm.slane %v1193_v38, 3 }
 0x30e   : > { %1643 = vst [vmem:[#allocation1 + $0x7] ss:$9 sm:$0xff] %v1365_v50  ;;  %v1395_v50 = vperm.slane %v1193_v38, 5 }
 0x315   : > { %v2907_v55 = vld [vmem:[#allocation1] sm:$0xff]  ;;  %1153 = vadd.xlane.f32.xlu0 %v1152_v40 }
 0x316   : > { %1645 = vst [vmem:[#allocation1] ss:$9 sm:$0xff] %v1366_v52  ;;  %v1063_v52 = vmul.f32 %v1018_v45, %v1018_v45 }
 0x317   : > { %1646 = vst [vmem:[#allocation1 + $0x1] ss:$9 sm:$0xff] %v1367_v61  ;;  %v1397_v61 = vperm.slane %v1193_v38, 7 }
 0x318   : > { %1647 = vst [vmem:[#allocation1 + $0x2] ss:$9 sm:$0xff] %v1368_v54  ;;  %v1146_v54 = vsel %vm1070_vm3, %v1063_v52, 0.0 }
 0x319   : > { %1648 = vst [vmem:[#allocation1 + $0x3] ss:$9 sm:$0xff] %v1369_v56  ;;  %v1800_v56 = vpop.permute.xlu2 %1799 }
 0x31a   : > { %1649 = vst [vmem:[#allocation1 + $0x4] ss:$9 sm:$0xff] %v1370_v57 }
 0x31b   : > { %1650 = vst [vmem:[#allocation1 + $0x5] ss:$9 sm:$0xff] %v1371_v58 }
 0x31c   : > { %1651 = vst [vmem:[#allocation1 + $0x6] ss:$9 sm:$0xff] %v1372_v60 }
 0x31d   : > { %1652 = vst [vmem:[#allocation1 + $0x7] ss:$9 sm:$0xff] %v1373_v62  ;;  %v2934_v62 = vadd.s32 4294967272, %v2883_v18 }
 0x322   : > { %1817 = vperm.xlu2 %2229, %v2846_v4   ;;  %v2930_v57 = vpop.f32.mrf.mxu3 }
 0x324   : > { %v2912_v0 = vld [vmem:[#allocation1] sm:$0xff] }
 0x325   : > { %1654 = vst [vmem:[#allocation1] ss:$9 sm:$0xff] %v1374_v25 }
 0x326   : > { %1655 = vst [vmem:[#allocation1 + $0x1] ss:$9 sm:$0xff] %v1375_v31 }
 0x327   : > { %1656 = vst [vmem:[#allocation1 + $0x2] ss:$9 sm:$0xff] %v1376_v36  ;;  %v2942_v36 = vadd.s32 4294967264, %v2883_v18 }
 0x328   : > { %1657 = vst [vmem:[#allocation1 + $0x3] ss:$9 sm:$0xff] %v1377_v1  ;;  %v1133_v58 = vpop.xlane.xlu2 %1132  ;;  %v1897_v1 = vperm.slane %v1800_v56, %v2934_v62  ;;  %v1027_v56 = vadd.f32 %v2878_v11, %v2930_v57  ;;  %v2973_v57 = vadd.s32 4294967240, %v2883_v18 }
 0x329   : > { %1658 = vst [vmem:[#allocation1 + $0x4] ss:$9 sm:$0xff] %v1378_v2  ;;  %1832 = vperm.xlu0 %2230, %v2896_v39   ;;  %v1194_v60 = vmul.f32 %v2799_v37, %v1133_v58 }
 0x32a   : > { %1659 = vst [vmem:[#allocation1 + $0x5] ss:$9 sm:$0xff] %v1379_v5  ;;  %v2936_v28 = vpop.f32.mrf.mxu3  ;;  %v1899_v9 = vsel %vm1898_vm7, %v1897_v1, %v2902_v47 }
 0x32b   : > { %1660 = vst [vmem:[#allocation1 + $0x6] ss:$9 sm:$0xff] %v1380_v6  ;;  %v1398_v63 = vperm.slane %v1194_v60, 0  ;;  %v1399_v59 = vperm.slane %v1194_v60, 1  ;;  %v1400_v25 = vperm.slane %v1194_v60, 2  ;;  %v1401_v4 = vperm.slane %v1194_v60, 3 }
 0x32c   : > { %1661 = vst [vmem:[#allocation1 + $0x7] ss:$9 sm:$0xff] %v1381_v8  ;;  %v1402_v39 = vperm.slane %v1194_v60, 4  ;;  %v1403_v2 = vperm.slane %v1194_v60, 5  ;;  %v1404_v5 = vperm.slane %v1194_v60, 6  ;;  %v1405_v6 = vperm.slane %v1194_v60, 7 }
 0x32d   : > { %1147 = vadd.xlane.f32.xlu1 %v1146_v54 }
 0x332   : > { %v1032_v16 = vpop.f32.mrf.mxu3 }
 0x333   : > { %v2918_v20 = vld [vmem:[#allocation1] sm:$0xff]  ;;  %v1033_v47 = vadd.f32 %v2878_v11, %v1032_v16 }
 0x334   : > { %1663 = vst [vmem:[#allocation1] ss:$9 sm:$0xff] %v1382_v14  ;;  %v1195_v14 = vmul.f32 %v2799_v37, %v1136_v44 }
 0x335   : > { %1664 = vst [vmem:[#allocation1 + $0x1] ss:$9 sm:$0xff] %v1383_v15  ;;  %v2953_v15 = vadd.s32 4294967256, %v2883_v18  ;;  %v1068_v38 = vmul.f32 %v1033_v47, %v1033_v47 }
 0x336   : > { %1665 = vst [vmem:[#allocation1 + $0x2] ss:$9 sm:$0xff] %v1384_v17  ;;  %v1806_v17 = vpop.permute.xlu1 %1805  ;;  %v1409_v34 = vperm.slane %v1195_v14, 3  ;;  %v1412_v45 = vperm.slane %v1195_v14, 6 }
 0x337   : > { %1666 = vst [vmem:[#allocation1 + $0x3] ss:$9 sm:$0xff] %v1385_v21  ;;  %v2956_v21 = vadd.s32 4294967248, %v2883_v18  ;;  %v1905_v26 = vperm.slane %v1806_v17, %v2953_v15 }
 0x338   : > { %1667 = vst [vmem:[#allocation1 + $0x4] ss:$9 sm:$0xff] %v1386_v24  ;;  %v1406_v24 = vperm.slane %v1195_v14, 0 }
 0x339   : > { %1668 = vst [vmem:[#allocation1 + $0x5] ss:$9 sm:$0xff] %v1387_v27  ;;  %v1407_v27 = vperm.slane %v1195_v14, 1 }
 0x33a   : > { %1669 = vst [vmem:[#allocation1 + $0x6] ss:$9 sm:$0xff] %v1388_v29 }
 0x33b   : > { %1670 = vst [vmem:[#allocation1 + $0x7] ss:$9 sm:$0xff] %v1389_v30  ;;  %v1408_v30 = vperm.slane %v1195_v14, 2 }
 0x342   : > { %v2925_v46 = vld [vmem:[#allocation1] sm:$0xff] }
 0x343   : > { %1672 = vst [vmem:[#allocation1] ss:$9 sm:$0xff] %v1390_v41  ;;  %v1410_v41 = vperm.slane %v1195_v14, 4 }
 0x344   : > { %1673 = vst [vmem:[#allocation1 + $0x1] ss:$9 sm:$0xff] %v1391_v42  ;;  %v1149_v42 = vsel %vm1070_vm3, %v1064_v22, 0.0  ;;  %v2988_v22 = vadd.s32 4294967224, %v2883_v18 }
 0x345   : > { %1674 = vst [vmem:[#allocation1 + $0x2] ss:$9 sm:$0xff] %v1392_v43  ;;  %v1411_v43 = vperm.slane %v1195_v14, 5 }
 0x346   : > { %1675 = vst [vmem:[#allocation1 + $0x3] ss:$9 sm:$0xff] %v1393_v48  ;;  %1820 = vperm.xlu1 %2231, %v2856_v19   ;;  %v1803_v19 = vpop.permute.xlu2 %1802  ;;  %v1413_v48 = vperm.slane %v1195_v14, 7 }
 0x347   : > { %1676 = vst [vmem:[#allocation1 + $0x4] ss:$9 sm:$0xff] %v1394_v49  ;;  %v1901_v8 = vperm.slane %v1803_v19, %v2942_v36  ;;  %v1161_v49 = vsel %vm1070_vm3, %v1068_v38, 0.0 }
 0x348   : > { %1677 = vst [vmem:[#allocation1 + $0x5] ss:$9 sm:$0xff] %v1395_v50 }
 0x349   : > { %1678 = vst [vmem:[#allocation1 + $0x6] ss:$9 sm:$0xff] %v1396_v51  ;;  %v1903_v12 = vsel %vm1902_vm8, %v1901_v8, %v1899_v9 }
 0x34a   : > { %1679 = vst [vmem:[#allocation1 + $0x7] ss:$9 sm:$0xff] %v1397_v61  ;;  %v1907_v32 = vsel %vm1906_vm9, %v1905_v26, %v1903_v12 }
 0x34b   : > { %1150 = vadd.xlane.f32.xlu2 %v1149_v42 }
 0x34e   : > { %v1809_v7 = vpop.permute.xlu2 %1808 }
 0x34f   : > { %v1909_v29 = vperm.slane %v1809_v7, %v2956_v21 }
 0x351   : > { %v2939_v31 = vld [vmem:[#allocation1] sm:$0xff]  ;;  %v1911_v40 = vsel %vm1910_vm10, %v1909_v29, %v1907_v32 }
 0x352   : > { %1681 = vst [vmem:[#allocation1] ss:$9 sm:$0xff] %v1398_v63 }
 0x353   : > { %1682 = vst [vmem:[#allocation1 + $0x1] ss:$9 sm:$0xff] %v1399_v59  ;;  %1162 = vadd.xlane.f32.xlu0 %v1161_v49 }
 0x354   : > { %1683 = vst [vmem:[#allocation1 + $0x2] ss:$9 sm:$0xff] %v1400_v25 }
 0x355   : > { %1684 = vst [vmem:[#allocation1 + $0x3] ss:$9 sm:$0xff] %v1401_v4  ;;  %v1066_v4 = vmul.f32 %v1027_v56, %v1027_v56 }
 0x356   : > { %1685 = vst [vmem:[#allocation1 + $0x4] ss:$9 sm:$0xff] %v1402_v39 }
 0x357   : > { %1686 = vst [vmem:[#allocation1 + $0x5] ss:$9 sm:$0xff] %v1403_v2  ;;  %v1155_v1 = vsel %vm1070_vm3, %v1066_v4, 0.0  ;;  %v2977_v2 = vadd.s32 4294967232, %v2883_v18 }
 0x358   : > { %1687 = vst [vmem:[#allocation1 + $0x6] ss:$9 sm:$0xff] %v1404_v5  ;;  %v1815_v5 = vpop.permute.xlu0 %1814 }
 0x359   : > { %1688 = vst [vmem:[#allocation1 + $0x7] ss:$9 sm:$0xff] %v1405_v6  ;;  %v1917_v8 = vperm.slane %v1815_v5, %v2977_v2 }
 0x35d   : > { %v1139_v50 = vpop.xlane.xlu1 %1138 }
 0x35e   : > { %v1196_v51 = vmul.f32 %v2799_v37, %v1139_v50 }
 0x360   : > { %v1689_v35 = vld [vmem:[#allocation1] sm:$0xff]  ;;  %v1414_v52 = vperm.slane %v1196_v51, 0  ;;  %v1415_v61 = vperm.slane %v1196_v51, 1  ;;  %v1416_v54 = vperm.slane %v1196_v51, 2  ;;  %v1417_v60 = vperm.slane %v1196_v51, 3 }
 0x361   : > { %1690 = vst [vmem:[#allocation1] ss:$9 sm:$0xff] %v1406_v24  ;;  %v1418_v63 = vperm.slane %v1196_v51, 4  ;;  %v1419_v59 = vperm.slane %v1196_v51, 5  ;;  %v1420_v25 = vperm.slane %v1196_v51, 6  ;;  %v1421_v39 = vperm.slane %v1196_v51, 7 }
 0x362   : > { %1691 = vst [vmem:[#allocation1 + $0x1] ss:$9 sm:$0xff] %v1407_v27  ;;  %v1030_v24 = vadd.f32 %v2878_v11, %v2936_v28 }
 0x363   : > { %1692 = vst [vmem:[#allocation1 + $0x2] ss:$9 sm:$0xff] %v1408_v30  ;;  %1826 = vperm.xlu2 %2229, %v2868_v53  }
 0x364   : > { %1693 = vst [vmem:[#allocation1 + $0x3] ss:$9 sm:$0xff] %v1409_v34  ;;  %v1067_v30 = vmul.f32 %v1030_v24, %v1030_v24  ;;  %v1145_v34 = vpop.xlane.xlu0 %1144 }
 0x365   : > { %1694 = vst [vmem:[#allocation1 + $0x4] ss:$9 sm:$0xff] %v1410_v41  ;;  %v1198_v28 = vmul.f32 %v2799_v37, %v1145_v34 }
 0x366   : > { %1695 = vst [vmem:[#allocation1 + $0x5] ss:$9 sm:$0xff] %v1411_v43 }
 0x367   : > { %1696 = vst [vmem:[#allocation1 + $0x6] ss:$9 sm:$0xff] %v1412_v45  ;;  %1841 = vperm.xlu0 %2230, %v2918_v20   ;;  %v1430_v38 = vperm.slane %v1198_v28, 0  ;;  %v1432_v42 = vperm.slane %v1198_v28, 2  ;;  %v1433_v43 = vperm.slane %v1198_v28, 3  ;;  %v1434_v45 = vperm.slane %v1198_v28, 4 }
 0x368   : > { %1697 = vst [vmem:[#allocation1 + $0x7] ss:$9 sm:$0xff] %v1413_v48  ;;  %v1435_v48 = vperm.slane %v1198_v28, 5  ;;  %v1436_v49 = vperm.slane %v1198_v28, 6  ;;  %v1437_v50 = vperm.slane %v1198_v28, 7 }
 0x36f   : > { %v2968_v58 = vld [vmem:[#allocation1] sm:$0xff]  ;;  %1850 = vperm.xlu0 %2230, %v1689_v35   ;;  %v1158_v35 = vsel %vm1070_vm3, %v1067_v30, 0.0 }
 0x370   : > { %1699 = vst [vmem:[#allocation1] ss:$9 sm:$0xff] %v1414_v52  ;;  %1156 = vadd.xlane.f32.xlu1 %v1155_v1  ;;  %v1035_v52 = vpop.f32.mrf.mxu3 }
 0x371   : > { %1700 = vst [vmem:[#allocation1 + $0x1] ss:$9 sm:$0xff] %v1415_v61 }
 0x372   : > { %1701 = vst [vmem:[#allocation1 + $0x2] ss:$9 sm:$0xff] %v1416_v54  ;;  %v1036_v54 = vadd.f32 %v2878_v11, %v1035_v52 }
 0x373   : > { %1702 = vst [vmem:[#allocation1 + $0x3] ss:$9 sm:$0xff] %v1417_v60 }
 0x374   : > { %1703 = vst [vmem:[#allocation1 + $0x4] ss:$9 sm:$0xff] %v1418_v63 }
 0x375   : > { %1704 = vst [vmem:[#allocation1 + $0x5] ss:$9 sm:$0xff] %v1419_v59  ;;  %v1812_v6 = vpop.permute.xlu1 %1811  ;;  %v1069_v59 = vmul.f32 %v1036_v54, %v1036_v54 }
 0x376   : > { %1705 = vst [vmem:[#allocation1 + $0x6] ss:$9 sm:$0xff] %v1420_v25  ;;  %v1913_v19 = vperm.slane %v1812_v6, %v2973_v57 }
 0x377   : > { %1706 = vst [vmem:[#allocation1 + $0x7] ss:$9 sm:$0xff] %v1421_v39  ;;  %v1164_v5 = vsel %vm1070_vm3, %v1069_v59, 0.0  ;;  %vm1946_vm3 = vcmask 1048512  }
 0x378   : > { %v1915_v9 = vsel %vm1914_vm11, %v1913_v19, %v1911_v40  ;;  %v1431_v40 = vperm.slane %v1198_v28, 1  ;;  %v3001_v19 = vadd.s32 4294967216, %v2883_v18 }
 0x379   : > { %v1919_v20 = vsel %vm1918_vm12, %v1917_v8, %v1915_v9  ;;  %v3004_v8 = vadd.s32 4294967208, %v2883_v18  ;;  %v1824_v9 = vpop.permute.xlu0 %1823 }
 0x37d   : > { %v1142_v44 = vpop.xlane.xlu2 %1141 }
 0x37e   : > { %v1197_v53 = vmul.f32 %v2799_v37, %v1142_v44  ;;  %v2985_v16 = vld [vmem:[#allocation1] sm:$0xff] }
 0x380   : > { %v1422_v12 = vperm.slane %v1197_v53, 0  ;;  %v1423_v13 = vperm.slane %v1197_v53, 1  ;;  %v1424_v14 = vperm.slane %v1197_v53, 2  ;;  %v1425_v17 = vperm.slane %v1197_v53, 3 }
 0x381   : > { %v1426_v47 = vperm.slane %v1197_v53, 4  ;;  %v1427_v26 = vperm.slane %v1197_v53, 5  ;;  %v1429_v7 = vperm.slane %v1197_v53, 7 }
 0x382   : > { %1708 = vst [vmem:[#allocation1] ss:$9 sm:$0xff] %v1422_v12 }
 0x383   : > { %1709 = vst [vmem:[#allocation1 + $0x1] ss:$9 sm:$0xff] %v1423_v13 }
 0x384   : > { %1710 = vst [vmem:[#allocation1 + $0x2] ss:$9 sm:$0xff] %v1424_v14 }
 0x385   : > { %1711 = vst [vmem:[#allocation1 + $0x3] ss:$9 sm:$0xff] %v1425_v17  ;;  %v1818_v27 = vpop.permute.xlu2 %1817 }
 0x386   : > { %1712 = vst [vmem:[#allocation1 + $0x4] ss:$9 sm:$0xff] %v1426_v47  ;;  %v1921_v29 = vperm.slane %v1818_v27, %v2988_v22  ;;  %v3015_v27 = vadd.s32 4294967200, %v2883_v18 }
 0x387   : > { %1713 = vst [vmem:[#allocation1 + $0x5] ss:$9 sm:$0xff] %v1427_v26 }
 0x388   : > { %v1923_v32 = vsel %vm1922_vm13, %v1921_v29, %v1919_v20  ;;  %1715 = vst [vmem:[#allocation1 + $0x7] ss:$9 sm:$0xff] %v1429_v7 }
 0x389   : > { %1829 = vperm.xlu1 %2231, %v2873_v3   ;;  %v1428_v3 = vperm.slane %v1197_v53, 6  ;;  %v1929_v53 = vperm.slane %v1824_v9, %v3004_v8 }
 0x38b   : > { %1714 = vst [vmem:[#allocation1 + $0x6] ss:$9 sm:$0xff] %v1428_v3 }
 0x38c   : > { %1159 = vadd.xlane.f32.xlu2 %v1158_v35 }
 0x392   : > { %v1716_v41 = vld [vmem:[#allocation1] sm:$0xff] }
 0x393   : > { %1717 = vst [vmem:[#allocation1] ss:$9 sm:$0xff] %v1430_v38  ;;  %1859 = vperm.xlu0 %2230, %v1716_v41  }
 0x394   : > { %1718 = vst [vmem:[#allocation1 + $0x1] ss:$9 sm:$0xff] %v1431_v40 }
 0x395   : > { %1719 = vst [vmem:[#allocation1 + $0x2] ss:$9 sm:$0xff] %v1432_v42 }
 0x396   : > { %1720 = vst [vmem:[#allocation1 + $0x3] ss:$9 sm:$0xff] %v1433_v43 }
 0x397   : > { %1721 = vst [vmem:[#allocation1 + $0x4] ss:$9 sm:$0xff] %v1434_v45 }
 0x398   : > { %1722 = vst [vmem:[#allocation1 + $0x5] ss:$9 sm:$0xff] %v1435_v48 }
 0x399   : > { %1723 = vst [vmem:[#allocation1 + $0x6] ss:$9 sm:$0xff] %v1436_v49 }
 0x39a   : > { %1724 = vst [vmem:[#allocation1 + $0x7] ss:$9 sm:$0xff] %v1437_v50 }
 0x3a0   : > { %v1148_v51 = vpop.xlane.xlu1 %1147 }
 0x3a1   : > { %v1199_v61 = vmul.f32 %v2799_v37, %v1148_v51  ;;  %v1725_v60 = vld [vmem:[#allocation1] sm:$0xff] }
 0x3a3   : > { %v1438_v56 = vperm.slane %v1199_v61, 0  ;;  %v1439_v63 = vperm.slane %v1199_v61, 1  ;;  %v1440_v25 = vperm.slane %v1199_v61, 2  ;;  %v1441_v4 = vperm.slane %v1199_v61, 3 }
 0x3a4   : > { %v1442_v39 = vperm.slane %v1199_v61, 4  ;;  %v1443_v1 = vperm.slane %v1199_v61, 5  ;;  %v1444_v6 = vperm.slane %v1199_v61, 6  ;;  %1835 = vperm.xlu2 %2229, %v2907_v55   ;;  %v1445_v11 = vperm.slane %v1199_v61, 7 }
 0x3a5   : > { %1726 = vst [vmem:[#allocation1] ss:$9 sm:$0xff] %v1438_v56 }
 0x3a6   : > { %1727 = vst [vmem:[#allocation1 + $0x1] ss:$9 sm:$0xff] %v1439_v63 }
 0x3a7   : > { %1728 = vst [vmem:[#allocation1 + $0x2] ss:$9 sm:$0xff] %v1440_v25  ;;  %v3024_v25 = vadd.s32 4294967192, %v2883_v18 }
 0x3a8   : > { %1729 = vst [vmem:[#allocation1 + $0x3] ss:$9 sm:$0xff] %v1441_v4  ;;  %v3027_v4 = vadd.s32 4294967184, %v2883_v18 }
 0x3a9   : > { %1730 = vst [vmem:[#allocation1 + $0x4] ss:$9 sm:$0xff] %v1442_v39 }
 0x3aa   : > { %1731 = vst [vmem:[#allocation1 + $0x5] ss:$9 sm:$0xff] %v1443_v1 }
 0x3ab   : > { %1732 = vst [vmem:[#allocation1 + $0x6] ss:$9 sm:$0xff] %v1444_v6 }
 0x3ac   : > { %1733 = vst [vmem:[#allocation1 + $0x7] ss:$9 sm:$0xff] %v1445_v11  ;;  %1844 = vperm.xlu2 %2229, %v2925_v46  }
 0x3b3   : > { %1165 = vadd.xlane.f32.xlu1 %v1164_v5  ;;  %v1734_v26 = vld [vmem:[#allocation1] sm:$0xff] }
 0x3b4   : > { %1853 = vperm.xlu2 %2229, %v2968_v58  }
 0x3b8   : > { %v1821_v20 = vpop.permute.xlu1 %1820 }
 0x3b9   : > { %v1925_v44 = vperm.slane %v1821_v20, %v3001_v19 }
 0x3bb   : > { %v1927_v55 = vsel %vm1926_vm14, %v1925_v44, %v1923_v32  ;;  %v1154_v32 = vpop.xlane.xlu0 %1153 }
 0x3bc   : > { %v1931_v12 = vsel %vm1930_vm15, %v1929_v53, %v1927_v55  ;;  %1862 = vperm.xlu2 %2229, %v1725_v60   ;;  %v1201_v28 = vmul.f32 %v2799_v37, %v1154_v32 }
 0x3be   : > { %v1151_v13 = vpop.xlane.xlu2 %1150  ;;  %v1454_v35 = vperm.slane %v1201_v28, 0  ;;  %v1455_v38 = vperm.slane %v1201_v28, 1  ;;  %v1457_v40 = vperm.slane %v1201_v28, 3  ;;  %v1458_v42 = vperm.slane %v1201_v28, 4 }
 0x3bf   : > { %v1200_v14 = vmul.f32 %v2799_v37, %v1151_v13  ;;  %v1459_v43 = vperm.slane %v1201_v28, 5  ;;  %v1460_v45 = vperm.slane %v1201_v28, 6  ;;  %v1461_v48 = vperm.slane %v1201_v28, 7 }
 0x3c1   : > { %v1446_v17 = vperm.slane %v1200_v14, 0  ;;  %v1447_v47 = vperm.slane %v1200_v14, 1  ;;  %v1448_v24 = vperm.slane %v1200_v14, 2  ;;  %v1449_v3 = vperm.slane %v1200_v14, 3 }
 0x3c2   : > { %v1450_v7 = vperm.slane %v1200_v14, 4  ;;  %v1451_v46 = vperm.slane %v1200_v14, 5  ;;  %v1452_v29 = vperm.slane %v1200_v14, 6 }
 0x3c3   : > { %1735 = vst [vmem:[#allocation1] ss:$9 sm:$0xff] %v1446_v17  ;;  %v1833_v39 = vpop.permute.xlu0 %1832 }
 0x3c4   : > { %1736 = vst [vmem:[#allocation1 + $0x1] ss:$9 sm:$0xff] %v1447_v47  ;;  %v1941_v6 = vperm.slane %v1833_v39, %v3027_v4 }
 0x3c5   : > { %1737 = vst [vmem:[#allocation1 + $0x2] ss:$9 sm:$0xff] %v1448_v24 }
 0x3c6   : > { %1738 = vst [vmem:[#allocation1 + $0x3] ss:$9 sm:$0xff] %v1449_v3  ;;  %v1827_v58 = vpop.permute.xlu2 %1826 }
 0x3c7   : > { %1739 = vst [vmem:[#allocation1 + $0x4] ss:$9 sm:$0xff] %v1450_v7  ;;  %v1933_v30 = vperm.slane %v1827_v58, %v3015_v27 }
 0x3c8   : > { %1740 = vst [vmem:[#allocation1 + $0x5] ss:$9 sm:$0xff] %v1451_v46 }
 0x3c9   : > { %1741 = vst [vmem:[#allocation1 + $0x6] ss:$9 sm:$0xff] %v1452_v29  ;;  %v1935_v34 = vsel %vm1934_vm0, %v1933_v30, %v1931_v12 }
 0x3cb   : > { %v1163_v3 = vpop.xlane.xlu0 %1162 }
 0x3cc   : > { %1838 = vperm.xlu1 %2231, %v2912_v0   ;;  %v1453_v0 = vperm.slane %v1200_v14, 7  ;;  %v1204_v7 = vmul.f32 %v2799_v37, %v1163_v3 }
 0x3ce   : > { %1742 = vst [vmem:[#allocation1 + $0x7] ss:$9 sm:$0xff] %v1453_v0  ;;  %v1478_v46 = vperm.slane %v1204_v7, 0  ;;  %v1479_v29 = vperm.slane %v1204_v7, 1  ;;  %v1480_v58 = vperm.slane %v1204_v7, 2  ;;  %v1481_v30 = vperm.slane %v1204_v7, 3 }
 0x3cf   : > { %v1482_v32 = vperm.slane %v1204_v7, 4 }
 0x3d4   : > { %1847 = vperm.xlu1 %2231, %v2939_v31   ;;  %v1456_v31 = vperm.slane %v1201_v28, 2  ;;  %v1484_v28 = vperm.slane %v1204_v7, 6 }
 0x3d5   : > { %v1743_v41 = vld [vmem:[#allocation1] sm:$0xff] }
 0x3d6   : > { %1868 = vperm.xlu0 %2230, %v1743_v41   ;;  %1744 = vst [vmem:[#allocation1] ss:$9 sm:$0xff] %v1454_v35 }
 0x3d7   : > { %1745 = vst [vmem:[#allocation1 + $0x1] ss:$9 sm:$0xff] %v1455_v38  ;;  %v1485_v38 = vperm.slane %v1204_v7, 7 }
 0x3d8   : > { %1746 = vst [vmem:[#allocation1 + $0x2] ss:$9 sm:$0xff] %v1456_v31 }
 0x3d9   : > { %1747 = vst [vmem:[#allocation1 + $0x3] ss:$9 sm:$0xff] %v1457_v40 }
 0x3da   : > { %1748 = vst [vmem:[#allocation1 + $0x4] ss:$9 sm:$0xff] %v1458_v42 }
 0x3db   : > { %1749 = vst [vmem:[#allocation1 + $0x5] ss:$9 sm:$0xff] %v1459_v43 }
 0x3dc   : > { %1856 = vperm.xlu1 %2231, %v2985_v16   ;;  %1750 = vst [vmem:[#allocation1 + $0x6] ss:$9 sm:$0xff] %v1460_v45 }
 0x3dd   : > { %1751 = vst [vmem:[#allocation1 + $0x7] ss:$9 sm:$0xff] %v1461_v48 }
 0x3e3   : > { %v1157_v49 = vpop.xlane.xlu1 %1156 }
 0x3e4   : > { %1865 = vperm.xlu1 %2231, %v1734_v26   ;;  %v1202_v16 = vmul.f32 %v2799_v37, %v1157_v49  ;;  %v1752_v54 = vld [vmem:[#allocation1] sm:$0xff] }
 0x3e5   : > { %1871 = vperm.xlu2 %2229, %v1752_v54  }
 0x3e6   : > { %v1462_v50 = vperm.slane %v1202_v16, 0  ;;  %v1463_v51 = vperm.slane %v1202_v16, 1  ;;  %v1464_v52 = vperm.slane %v1202_v16, 2  ;;  %v1465_v61 = vperm.slane %v1202_v16, 3 }
 0x3e7   : > { %v1466_v56 = vperm.slane %v1202_v16, 4  ;;  %v1467_v60 = vperm.slane %v1202_v16, 5  ;;  %v1468_v63 = vperm.slane %v1202_v16, 6  ;;  %v1469_v59 = vperm.slane %v1202_v16, 7 }
 0x3e8   : > { %1753 = vst [vmem:[#allocation1] ss:$9 sm:$0xff] %v1462_v50 }
 0x3e9   : > { %1754 = vst [vmem:[#allocation1 + $0x1] ss:$9 sm:$0xff] %v1463_v51 }
 0x3ea   : > { %1755 = vst [vmem:[#allocation1 + $0x2] ss:$9 sm:$0xff] %v1464_v52 }
 0x3eb   : > { %1756 = vst [vmem:[#allocation1 + $0x3] ss:$9 sm:$0xff] %v1465_v61  ;;  %v1842_v61 = vpop.permute.xlu0 %1841 }
 0x3ec   : > { %1757 = vst [vmem:[#allocation1 + $0x4] ss:$9 sm:$0xff] %v1466_v56 }
 0x3ed   : > { %1758 = vst [vmem:[#allocation1 + $0x5] ss:$9 sm:$0xff] %v1467_v60 }
 0x3ee   : > { %1759 = vst [vmem:[#allocation1 + $0x6] ss:$9 sm:$0xff] %v1468_v63 }
 0x3ef   : > { %1760 = vst [vmem:[#allocation1 + $0x7] ss:$9 sm:$0xff] %v1469_v59  ;;  %v1949_v59 = vperm.slane %v1842_v61, %v2888_v23 }
 0x3f3   : > { %v1851_v60 = vpop.permute.xlu0 %1850 }
 0x3f6   : > { %v1761_v11 = vld [vmem:[#allocation1] sm:$0xff] }
 0x3f7   : > { %1874 = vperm.xlu1 %2231, %v1761_v11  }
 0x3fb   : > { %v1830_v1 = vpop.permute.xlu1 %1829 }
 0x3fc   : > { %v1937_v5 = vperm.slane %v1830_v1, %v3024_v25 }
 0x3fe   : > { %v1939_v9 = vsel %vm1938_vm1, %v1937_v5, %v1935_v34  ;;  %v1483_v34 = vperm.slane %v1204_v7, 5 }
 0x3ff   : > { %v3033_v20 = vsel %vm1942_vm2, %v1941_v6, %v1939_v9  ;;  %v1160_v44 = vpop.xlane.xlu2 %1159 }
 0x400   : > { %v1203_v53 = vmul.f32 %v2799_v37, %v1160_v44 }
 0x402   : > { %v1470_v55 = vperm.slane %v1203_v53, 0  ;;  %v1471_v12 = vperm.slane %v1203_v53, 1  ;;  %v1472_v13 = vperm.slane %v1203_v53, 2  ;;  %v1473_v14 = vperm.slane %v1203_v53, 3 }
 0x403   : > { %v1474_v17 = vperm.slane %v1203_v53, 4  ;;  %v1475_v47 = vperm.slane %v1203_v53, 5  ;;  %v1476_v24 = vperm.slane %v1203_v53, 6  ;;  %v1477_v26 = vperm.slane %v1203_v53, 7 }
 0x404   : > { %1762 = vst [vmem:[#allocation1] ss:$9 sm:$0xff] %v1470_v55  ;;  %v1955_v55 = vperm.slane %v1851_v60, %v2942_v36 }
 0x405   : > { %1763 = vst [vmem:[#allocation1 + $0x1] ss:$9 sm:$0xff] %v1471_v12  ;;  %v1860_v9 = vpop.permute.xlu0 %1859 }
 0x406   : > { %1764 = vst [vmem:[#allocation1 + $0x2] ss:$9 sm:$0xff] %v1472_v13 }
 0x407   : > { %1765 = vst [vmem:[#allocation1 + $0x3] ss:$9 sm:$0xff] %v1473_v14 }
 0x408   : > { %1766 = vst [vmem:[#allocation1 + $0x4] ss:$9 sm:$0xff] %v1474_v17 }
 0x409   : > { %1767 = vst [vmem:[#allocation1 + $0x5] ss:$9 sm:$0xff] %v1475_v47 }
 0x40a   : > { %1768 = vst [vmem:[#allocation1 + $0x6] ss:$9 sm:$0xff] %v1476_v24  ;;  %v1961_v24 = vperm.slane %v1860_v9, %v2973_v57 }
 0x40b   : > { %1769 = vst [vmem:[#allocation1 + $0x7] ss:$9 sm:$0xff] %v1477_v26 }
 0x412   : > { %v1770_v0 = vld [vmem:[#allocation1] sm:$0xff] }
 0x413   : > { %1877 = vperm.xlu0 %2230, %v1770_v0   ;;  %1771 = vst [vmem:[#allocation1] ss:$9 sm:$0xff] %v1478_v46 }
 0x414   : > { %1772 = vst [vmem:[#allocation1 + $0x1] ss:$9 sm:$0xff] %v1479_v29 }
 0x415   : > { %1773 = vst [vmem:[#allocation1 + $0x2] ss:$9 sm:$0xff] %v1480_v58 }
 0x416   : > { %1774 = vst [vmem:[#allocation1 + $0x3] ss:$9 sm:$0xff] %v1481_v30 }
 0x417   : > { %1775 = vst [vmem:[#allocation1 + $0x4] ss:$9 sm:$0xff] %v1482_v32 }
 0x418   : > { %1776 = vst [vmem:[#allocation1 + $0x5] ss:$9 sm:$0xff] %v1483_v34 }
 0x419   : > { %1777 = vst [vmem:[#allocation1 + $0x6] ss:$9 sm:$0xff] %v1484_v28 }
 0x41a   : > { %1778 = vst [vmem:[#allocation1 + $0x7] ss:$9 sm:$0xff] %v1485_v38 }
 0x421   : > { %v1779_v45 = vld [vmem:[#allocation1] sm:$0xff] }
 0x422   : > { %1880 = vperm.xlu2 %2229, %v1779_v45  }
 0x426   : > { %v1166_v35 = vpop.xlane.xlu1 %1165 }
 0x427   : > { %v1205_v31 = vmul.f32 %v2799_v37, %v1166_v35  ;;  %v3038_v37 = vpop.permute.xlu2 %1835 }
 0x429   : > { %v1486_v40 = vperm.slane %v1205_v31, 0  ;;  %v1487_v41 = vperm.slane %v1205_v31, 1  ;;  %v1488_v42 = vperm.slane %v1205_v31, 2  ;;  %v1489_v43 = vperm.slane %v1205_v31, 3 }
 0x42a   : > { %v1490_v48 = vperm.slane %v1205_v31, 4  ;;  %v1491_v49 = vperm.slane %v1205_v31, 5  ;;  %v1492_v16 = vperm.slane %v1205_v31, 6  ;;  %v1493_v50 = vperm.slane %v1205_v31, 7 }
 0x42b   : > { %1780 = vst [vmem:[#allocation1] ss:$9 sm:$0xff] %v1486_v40 }
 0x42c   : > { %1781 = vst [vmem:[#allocation1 + $0x1] ss:$9 sm:$0xff] %v1487_v41 }
 0x42d   : > { %1782 = vst [vmem:[#allocation1 + $0x2] ss:$9 sm:$0xff] %v1488_v42 }
 0x42e   : > { %1783 = vst [vmem:[#allocation1 + $0x3] ss:$9 sm:$0xff] %v1489_v43 }
 0x42f   : > { %1784 = vst [vmem:[#allocation1 + $0x4] ss:$9 sm:$0xff] %v1490_v48  ;;  %v1845_v54 = vpop.permute.xlu2 %1844 }
 0x430   : > { %1785 = vst [vmem:[#allocation1 + $0x5] ss:$9 sm:$0xff] %v1491_v49  ;;  %v1951_v11 = vperm.slane %v1845_v54, %v2893_v33 }
 0x431   : > { %1786 = vst [vmem:[#allocation1 + $0x6] ss:$9 sm:$0xff] %v1492_v16 }
 0x432   : > { %1787 = vst [vmem:[#allocation1 + $0x7] ss:$9 sm:$0xff] %v1493_v50 }
 0x437   : > { %v1854_v39 = vpop.permute.xlu2 %1853 }
 0x438   : > { %v1957_v23 = vperm.slane %v1854_v39, %v2953_v15 }
 0x439   : > { %v1788_v51 = vld [vmem:[#allocation1] sm:$0xff] }
 0x43a   : > { %1883 = vperm.xlu1 %2231, %v1788_v51  }
 0x43e   : > { %v1839_v52 = vpop.permute.xlu1 %1838 }
 0x43f   : > { %v1948_v63 = vperm.slane %v1839_v52, %v2883_v18  ;;  %v1863_v14 = vpop.permute.xlu2 %1862 }
 0x441   : > { %v1950_v1 = vsel %vm1890_vm5, %v1949_v59, %v1948_v63  ;;  %vm1985_vm5 = vcmp.lt.s32.totalorder %v1885_v10, 256 }
 0x442   : > { %v1952_v44 = vsel %vm1894_vm6, %v1951_v11, %v1950_v1 }
 0x446   : > { %v1848_v56 = vpop.permute.xlu1 %1847 }
 0x447   : > { %v1953_v5 = vperm.slane %v1848_v56, %v2934_v62  ;;  %v1872_v3 = vpop.permute.xlu2 %1871 }
 0x448   : > { %v1869_v47 = vpop.permute.xlu0 %1868  ;;  %v1969_v30 = vperm.slane %v1872_v3, %v3004_v8 }
 0x449   : > { %v1954_v53 = vsel %vm1898_vm7, %v1953_v5, %v1952_v44  ;;  %v1967_v29 = vperm.slane %v1869_v47, %v3001_v19 }
 0x44a   : > { %v1956_v12 = vsel %vm1902_vm8, %v1955_v55, %v1954_v53 }
 0x44b   : > { %v1958_v62 = vsel %vm1906_vm9, %v1957_v23, %v1956_v12 }
 0x44e   : > { %v1857_v6 = vpop.permute.xlu1 %1856 }
 0x44f   : > { %v1959_v13 = vperm.slane %v1857_v6, %v2956_v21  ;;  %v1963_v21 = vperm.slane %v1863_v14, %v2977_v2  ;;  %v1944_v2 = vadd.s32 4294967176, %v2883_v18 }
 0x451   : > { %v1960_v33 = vsel %vm1910_vm10, %v1959_v13, %v1958_v62 }
 0x452   : > { %v1962_v36 = vsel %vm1914_vm11, %v1961_v24, %v1960_v33 }
 0x453   : > { %v1964_v15 = vsel %vm1918_vm12, %v1963_v21, %v1962_v36 }
 0x456   : > { %v1866_v17 = vpop.permute.xlu1 %1865 }
 0x457   : > { %v1965_v26 = vperm.slane %v1866_v17, %v2988_v22 }
 0x459   : > { %v1966_v7 = vsel %vm1922_vm13, %v1965_v26, %v1964_v15 }
 0x45a   : > { %v1968_v58 = vsel %vm1926_vm14, %v1967_v29, %v1966_v7 }
 0x45b   : > { %v1970_v32 = vsel %vm1930_vm15, %v1969_v30, %v1968_v58 }
 0x469   : > { %v1875_v46 = vpop.permute.xlu1 %1874 }
 0x46a   : > { %v1971_v57 = vperm.slane %v1875_v46, %v3015_v27 }
 0x46c   : > { %v1972_v19 = vsel %vm1934_vm0, %v1971_v57, %v1970_v32 }
 0x47c   : > { %v1881_v34 = vpop.permute.xlu2 %1880 }
 0x47d   : > { %v1975_v8 = vperm.slane %v1881_v34, %v3027_v4 }
 0x485   : > { %v1878_v0 = vpop.permute.xlu0 %1877 }
 0x486   : > { %v1973_v22 = vperm.slane %v1878_v0, %v3024_v25  ;;  %v1945_v25 = vperm.slane %v3038_v37, %v1944_v2 }
 0x488   : > { %v1974_v28 = vsel %vm1938_vm1, %v1973_v22, %v1972_v19  ;;  %v1947_v40 = vsel %vm1946_vm3, %v1945_v25, %v3033_v20 }
 0x489   : > { %v1976_v18 = vsel %vm1942_vm2, %v1975_v8, %v1974_v28 }
 0x4ac   : > { %v1884_v27 = vpop.permute.xlu1 %1883 }
 0x4ad   : > { %v1977_v35 = vperm.slane %v1884_v27, %v1944_v2 }
 0x4af   : > { %v1978_v38 = vsel %vm1946_vm3, %v1977_v35, %v1976_v18 }
 0x4b0   : > { %v1979_v31 = vrot.slane %v1978_v38, 7 }
 0x4b2   : > { %v1981_v4 = vsel %vm1980_vm4, %v1947_v40, %v1979_v31 }
 0x4b3   : > { %1987 = vst.msk [vmem:[%s272_s28] sm:$0x3] %vm1985_vm5, %v1981_v4 }
 0x4b4   : > { %2394 = shalt.err (!%p2391_p3)
}
 0x4b5   : > { %2188 = dma.vmem_to_hbm [thread:$0]  (%p2511_p5), %s2002_s14, 32, %s2004_s15, %s1989_s19  }
 0x4b6 PF: > { %p2194_p4 = scmp.ge.s32.totalorder %s2429_s27, 2  ;;  %s2015_s22 = sand.u32 1, %s2417_s24  }
 0x4b7   : > { %s2016_s8 = scalar_lea.sflag [#allocation3], %s2015_s22 }
 0x4b8   : > { %p2191_p7 = pnand %p2194_p4, %p2515_p6 }
 0x4ba   : > { %p2192_p8 = pneg %p2191_p7 }
 0x4bc   : > { %2412 = dma.done.wait (%p2192_p8), %s2016_s8, 32  }
 0x4bd   : > { %2414 = vsyncadd (%p2192_p8), %s2016_s8, 4294967264  ;;  %p17_p9 = scmp.ge.s32.totalorder %s2498_s30, 4   ;;  %s3119_s24 = smov %s2421_s25 }
 0x4be   : > { %s3120_s25 = smov %s2425_s26  ;;  %s3121_s26 = smov %s2509_s10 }
 0x4bf   : > { %s3122_s27 = smov %s2498_s30  ;;  %19 = sbr.rel (!%p17_p9) target bundleno = 3 (0x3), region = 90 }
 0x4c4   :  { %2022 = vsyncpa [#allocation3], 1 }
 0x4c5   :  { %2024 = vsyncpa [#allocation3 + $0x1], 1 }

</bundles_post_ra>
